<compile_context>
chip_gen: v5e
topology: v5e:2x2
jax: 0.10.0
libtpu: 0.0.40
codegen_flags: <defaults>
</compile_context>

<pallas_src>
import functools
import math

import jax
import jax.numpy as jnp
from jax.experimental import pallas as pl
from jax.experimental.pallas import tpu as pltpu

_BN_EPS = 1e-5


def _round_up(x, m):
    return ((x + m - 1) // m) * m


def _pick(dim, cands):
    for c in cands:
        if dim % c == 0:
            return c
    return None


# ------------- generic fused matmul + folded-BN + residual + ReLU kernel -----------

def _make_mm_kernel(relu, has_res, single_k):
    def kernel(*refs):
        if single_k:
            if has_res:
                x_ref, w_ref, s_ref, b_ref, r_ref, o_ref = refs
            else:
                x_ref, w_ref, s_ref, b_ref, o_ref = refs
                r_ref = None
            y = jnp.dot(x_ref[...], w_ref[...], preferred_element_type=jnp.float32)
            y = y * s_ref[...] + b_ref[...]
            if r_ref is not None:
                y = y + r_ref[...].astype(jnp.float32)
            if relu:
                y = jnp.maximum(y, 0.0)
            o_ref[...] = y.astype(o_ref.dtype)
            return

        if has_res:
            x_ref, w_ref, s_ref, b_ref, r_ref, o_ref, acc_ref = refs
        else:
            x_ref, w_ref, s_ref, b_ref, o_ref, acc_ref = refs
            r_ref = None
        k = pl.program_id(2)

        @pl.when(k == 0)
        def _():
            acc_ref[...] = jnp.zeros_like(acc_ref)

        acc_ref[...] += jnp.dot(x_ref[...], w_ref[...],
                                preferred_element_type=jnp.float32)

        @pl.when(k == pl.num_programs(2) - 1)
        def _():
            y = acc_ref[...] * s_ref[...] + b_ref[...]
            if r_ref is not None:
                y = y + r_ref[...].astype(jnp.float32)
            if relu:
                y = jnp.maximum(y, 0.0)
            o_ref[...] = y.astype(o_ref.dtype)

    return kernel


def _matmul_bn_act(x, w, scale, bias, residual, relu, out_dtype):
    """out = act((x @ w) * scale + bias (+ residual)); bf16 MXU, f32 accumulation."""
    M, K = x.shape
    _, N = w.shape
    x = x.astype(jnp.bfloat16)
    w = w.astype(jnp.bfloat16)

    # --- tile selection: prefer tiles that divide the problem (no padding copies) ---
    tm = _pick(M, (512, 256, 128, 64))
    if tm is None:
        if M < 256:
            Mp = _round_up(M, 8)
            tm = Mp
        else:
            Mp = _round_up(M, 256)
            tm = 256
    else:
        Mp = M

    tk = _pick(K, (512, 256, 128))
    if tk is None:
        if K <= 1024:
            tk, Kp = K, K                 # full-K single reduction step (e.g. K=147)
        else:
            Kp = _round_up(K, 128)
            tk = 128
    else:
        Kp = K

    tn = _pick(N, (256, 128))
    if tn is None:
        if N <= 512:
            tn, Np = N, N                 # e.g. Cout=64
        else:
            Np = _round_up(N, 128)
            tn = 128
    else:
        Np = N

    # v7x: make sure at least 2 "parallel" grid steps exist so both cores are used.
    if (Mp // tm) == 1 and (Np // tn) == 1 and tm % 16 == 0:
        tm //= 2

    xp = x if (Mp == M and Kp == K) else jnp.pad(x, ((0, Mp - M), (0, Kp - K)))
    wp = w if (Kp == K and Np == N) else jnp.pad(w, ((0, Kp - K), (0, Np - N)))
    s2 = scale.astype(jnp.float32)
    b2 = bias.astype(jnp.float32)
    if Np != N:
        s2 = jnp.pad(s2, (0, Np - N))
        b2 = jnp.pad(b2, (0, Np - N))
    s2 = s2.reshape(1, Np)
    b2 = b2.reshape(1, Np)

    single_k = (Kp == tk)
    if single_k:
        grid = (Mp // tm, Np // tn)
        in_specs = [
            pl.BlockSpec((tm, tk), lambda i, j: (i, 0)),
            pl.BlockSpec((tk, tn), lambda i, j: (0, j)),
            pl.BlockSpec((1, tn), lambda i, j: (0, j)),
            pl.BlockSpec((1, tn), lambda i, j: (0, j)),
        ]
        res_spec = pl.BlockSpec((tm, tn), lambda i, j: (i, j))
        out_spec = pl.BlockSpec((tm, tn), lambda i, j: (i, j))
        scratch = []
        dims = ("parallel", "parallel")
    else:
        grid = (Mp // tm, Np // tn, Kp // tk)
        in_specs = [
            pl.BlockSpec((tm, tk), lambda i, j, k: (i, k)),
            pl.BlockSpec((tk, tn), lambda i, j, k: (k, j)),
            pl.BlockSpec((1, tn), lambda i, j, k: (0, j)),
            pl.BlockSpec((1, tn), lambda i, j, k: (0, j)),
        ]
        res_spec = pl.BlockSpec((tm, tn), lambda i, j, k: (i, j))
        out_spec = pl.BlockSpec((tm, tn), lambda i, j, k: (i, j))
        scratch = [pltpu.VMEM((tm, tn), jnp.float32)]
        dims = ("parallel", "parallel", "arbitrary")

    args = [xp, wp, s2, b2]
    if residual is not None:
        r = residual.astype(jnp.bfloat16)
        if Mp != M or Np != N:
            r = jnp.pad(r, ((0, Mp - M), (0, Np - N)))
        in_specs.append(res_spec)
        args.append(r)

    out = pl.pallas_call(
        _make_mm_kernel(relu, residual is not None, single_k),
        out_shape=jax.ShapeDtypeStruct((Mp, Np), out_dtype),
        grid_spec=pltpu.PrefetchScalarGridSpec(
            num_scalar_prefetch=0,
            grid=grid,
            in_specs=in_specs,
            out_specs=out_spec,
            scratch_shapes=scratch),
        compiler_params=pltpu.CompilerParams(dimension_semantics=dims),
    )(*args)
    if Mp != M or Np != N:
        out = out[:M, :N]
    return out


# --------------------- direct 3x3 / stride-1 conv (no im2col) ----------------------
# Padded activation for one image is flattened to ((h+3)*wq, Cin) with wq a multiple
# of 8 (sublane-aligned row stride); the 9 taps are statically-shifted matmuls
# accumulated into a VMEM f32 scratch.  Wide garbage columns are sliced off outside.

def _direct_conv_kernel(x_ref, w_ref, s_ref, b_ref, o_ref, acc_ref, *, kw, wq, relu):
    m_out = o_ref.shape[0]
    taps = w_ref.shape[0]
    for t in range(taps):                       # static unroll (9 taps)
        dy, dx = divmod(t, kw)
        off = dy * wq + dx
        contrib = jnp.dot(x_ref[pl.ds(off, m_out), :], w_ref[t],
                          preferred_element_type=jnp.float32)
        if t == 0:
            acc_ref[...] = contrib
        else:
            acc_ref[...] += contrib
    y = acc_ref[...] * s_ref[...] + b_ref[...]
    if relu:
        y = jnp.maximum(y, 0.0)
    o_ref[...] = y.astype(o_ref.dtype)


def _conv3x3_s1_direct(x, w, scale, bias, relu):
    # x: [N,H,W,Cin] bf16   w: [3,3,Cin,Cout] bf16   stride 1, padding 1
    n, h, wd, cin = x.shape
    kh, kw, _, cout = w.shape
    wq = _round_up(wd + kw - 1, 8)        # aligned padded row length
    hp = h + kh                           # padded height (incl. guard rows)
    m_in = hp * wq
    m_out = h * wq
    xp = jnp.pad(x, ((0, 0), (1, kh - 1), (1, wq - wd - 1), (0, 0)))
    xf = xp.reshape(n, m_in, cin)
    wf = w.reshape(kh * kw, cin, cout)
    tn = 256 if cout % 256 == 0 else (128 if cout % 128 == 0 else cout)
    s2 = scale.astype(jnp.float32).reshape(1, cout)
    b2 = bias.astype(jnp.float32).reshape(1, cout)

    out = pl.pallas_call(
        functools.partial(_direct_conv_kernel, kw=kw, wq=wq, relu=relu),
        out_shape=jax.ShapeDtypeStruct((n, m_out, cout), jnp.bfloat16),
        grid_spec=pltpu.PrefetchScalarGridSpec(
            num_scalar_prefetch=0,
            grid=(cout // tn, n),          # weights outer -> stay resident over batch
            in_specs=[
                pl.BlockSpec((None, m_in, cin), lambda j, ni: (ni, 0, 0)),
                pl.BlockSpec((kh * kw, cin, tn), lambda j, ni: (0, 0, j)),
                pl.BlockSpec((1, tn), lambda j, ni: (0, j)),
                pl.BlockSpec((1, tn), lambda j, ni: (0, j)),
            ],
            out_specs=pl.BlockSpec((None, m_out, tn), lambda j, ni: (ni, 0, j)),
            scratch_shapes=[pltpu.VMEM((m_out, tn), jnp.float32)]),
        compiler_params=pltpu.CompilerParams(
            dimension_semantics=("parallel", "parallel")),
    )(xf, wf, s2, b2)
    out = out.reshape(n, h, wq, cout)
    return out[:, :, :wd, :]


# --------------------- im2col path (only strided convs / 1x1) ----------------------

def _im2col(x, kh, kw, stride, padding):
    n, h, w, c = x.shape
    oh = (h + 2 * padding - kh) // stride + 1
    ow = (w + 2 * padding - kw) // stride + 1
    xp = jnp.pad(x, ((0, 0), (padding, padding), (padding, padding), (0, 0)))
    cols = []
    for dy in range(kh):
        for dx in range(kw):
            cols.append(xp[:, dy::stride, dx::stride, :][:, :oh, :ow, :])
    patches = jnp.concatenate(cols, axis=-1) if len(cols) > 1 else cols[0]
    return patches.reshape(n * oh * ow, kh * kw * c), oh, ow


@functools.partial(jax.jit, static_argnames=("stride", "padding", "relu"))
def conv_bn_act(x, w, scale, bias, residual=None, *, stride, padding, relu):
    # x: [N,H,W,Cin]   w: [KH,KW,Cin,Cout]   folded-BN scale/bias: [Cout]
    n = x.shape[0]
    kh, kw, cin, cout = w.shape
    xb = x.astype(jnp.bfloat16)
    wb = w.astype(jnp.bfloat16)
    if kh == 3 and kw == 3 and stride == 1 and padding == 1 and residual is None:
        return _conv3x3_s1_direct(xb, wb, scale, bias, relu)
    # stem 7x7/s2, stride-2 3x3 convs and 1x1 convs (residual fused on the 1x1 path)
    patches, oh, ow = _im2col(xb, kh, kw, stride, padding)
    w2 = wb.reshape(kh * kw * cin, cout)
    res2 = None if residual is None else residual.reshape(n * oh * ow, cout)
    out = _matmul_bn_act(patches, w2, scale, bias, res2, relu, jnp.bfloat16)
    return out.reshape(n, oh, ow, cout)


# -------------------- fully fused stride-1 Bottleneck block ------------------------
# One pallas_call per (batch of) images: conv1(1x1)+BN+ReLU -> conv2(3x3)+BN+ReLU ->
# conv3(1x1)+BN + identity + ReLU, all on the zero-padded "wide" (h, wq) grid kept
# in VMEM.  The identity is read as a shifted slice of the padded input plane.

def _fused_block_kernel(xp_ref, mask_ref, w1_ref, s1_ref, b1_ref,
                        w2_ref, s2_ref, b2_ref, w3_ref, s3_ref, b3_ref,
                        o_ref, t1_ref, acc_ref, *, wq, m_out):
    # conv1 (1x1) + BN + ReLU, then force pad positions back to zero
    t1 = jnp.dot(xp_ref[...], w1_ref[...], preferred_element_type=jnp.float32)
    t1 = jnp.maximum(t1 * s1_ref[...] + b1_ref[...], 0.0)
    t1_ref[...] = (t1 * mask_ref[...]).astype(jnp.bfloat16)

    # conv2 (3x3, stride 1) as 9 statically shifted matmuls into a VMEM accumulator
    for t in range(9):
        dy, dx = divmod(t, 3)
        off = dy * wq + dx
        contrib = jnp.dot(t1_ref[pl.ds(off, m_out), :], w2_ref[t],
                          preferred_element_type=jnp.float32)
        if t == 0:
            acc_ref[...] = contrib
        else:
            acc_ref[...] += contrib
    t2 = jnp.maximum(acc_ref[...] * s2_ref[...] + b2_ref[...], 0.0
                     ).astype(jnp.bfloat16)

    # conv3 (1x1) + BN + residual + ReLU  (identity = shifted interior of xp)
    y = jnp.dot(t2, w3_ref[...], preferred_element_type=jnp.float32)
    y = y * s3_ref[...] + b3_ref[...]
    y = y + xp_ref[pl.ds(wq + 1, m_out), :].astype(jnp.float32)
    o_ref[...] = jnp.maximum(y, 0.0).astype(o_ref.dtype)


@jax.jit
def fused_bottleneck_s1(x, w1, s1, b1, w2, s2, b2, w3, s3, b3):
    n, h, wd, cin = x.shape
    p = w2.shape[-1]
    cout = w3.shape[-1]
    wq = _round_up(wd + 2, 8)
    hp = h + 3
    m_in = hp * wq
    m_out = h * wq

    xb = x.astype(jnp.bfloat16)
    xp = jnp.pad(xb, ((0, 0), (1, 2), (1, wq - wd - 1), (0, 0))).reshape(n, m_in, cin)

    ri = jnp.arange(hp)
    ci = jnp.arange(wq)
    mask2 = ((ri[:, None] >= 1) & (ri[:, None] <= h) &
             (ci[None, :] >= 1) & (ci[None, :] <= wd))
    mask = mask2.astype(jnp.float32).reshape(m_in, 1)

    w1m = w1.reshape(cin, p).astype(jnp.bfloat16)
    w2m = w2.reshape(9, p, p).astype(jnp.bfloat16)
    w3m = w3.reshape(p, cout).astype(jnp.bfloat16)
    s1r = s1.astype(jnp.float32).reshape(1, p)
    b1r = b1.astype(jnp.float32).reshape(1, p)
    s2r = s2.astype(jnp.float32).reshape(1, p)
    b2r = b2.astype(jnp.float32).reshape(1, p)
    s3r = s3.astype(jnp.float32).reshape(1, cout)
    b3r = b3.astype(jnp.float32).reshape(1, cout)

    out = pl.pallas_call(
        functools.partial(_fused_block_kernel, wq=wq, m_out=m_out),
        out_shape=jax.ShapeDtypeStruct((n, m_out, cout), jnp.bfloat16),
        grid_spec=pltpu.PrefetchScalarGridSpec(
            num_scalar_prefetch=0,
            grid=(n,),
            in_specs=[
                pl.BlockSpec((None, m_in, cin), lambda i: (i, 0, 0)),
                pl.BlockSpec((m_in, 1), lambda i: (0, 0)),
                pl.BlockSpec((cin, p), lambda i: (0, 0)),
                pl.BlockSpec((1, p), lambda i: (0, 0)),
                pl.BlockSpec((1, p), lambda i: (0, 0)),
                pl.BlockSpec((9, p, p), lambda i: (0, 0, 0)),
                pl.BlockSpec((1, p), lambda i: (0, 0)),
                pl.BlockSpec((1, p), lambda i: (0, 0)),
                pl.BlockSpec((p, cout), lambda i: (0, 0)),
                pl.BlockSpec((1, cout), lambda i: (0, 0)),
                pl.BlockSpec((1, cout), lambda i: (0, 0)),
            ],
            out_specs=pl.BlockSpec((None, m_out, cout), lambda i: (i, 0, 0)),
            scratch_shapes=[pltpu.VMEM((m_in, p), jnp.bfloat16),
                            pltpu.VMEM((m_out, p), jnp.float32)]),
        compiler_params=pltpu.CompilerParams(
            dimension_semantics=("parallel",),
            vmem_limit_bytes=40 * 1024 * 1024),
    )(xp, mask, w1m, s1r, b1r, w2m, s2r, b2r, w3m, s3r, b3r)

    out = out.reshape(n, h, wq, cout)
    return out[:, :, :wd, :]


# ------------------------------------ pooling --------------------------------------

def _maxpool_kernel(ee_ref, eo_ref, oe_ref, oo_ref, o_ref):
    oh, ow, _ = o_ref.shape

    def s(ref, r0, c0):
        return ref[pl.ds(r0, oh), pl.ds(c0, ow), :]

    m = s(ee_ref, 0, 0)
    m = jnp.maximum(m, s(ee_ref, 0, 1))
    m = jnp.maximum(m, s(ee_ref, 1, 0))
    m = jnp.maximum(m, s(ee_ref, 1, 1))
    m = jnp.maximum(m, s(eo_ref, 0, 0))
    m = jnp.maximum(m, s(eo_ref, 1, 0))
    m = jnp.maximum(m, s(oe_ref, 0, 0))
    m = jnp.maximum(m, s(oe_ref, 0, 1))
    m = jnp.maximum(m, s(oo_ref, 0, 0))
    o_ref[...] = m


@jax.jit
def maxpool_3x3_s2_p1(x):
    n, h, w, c = x.shape
    oh = (h - 1) // 2 + 1
    ow = (w - 1) // 2 + 1
    ph = 2 * (oh + 1) - h - 1
    pw = 2 * (ow + 1) - w - 1
    xp = jnp.pad(x, ((0, 0), (1, ph), (1, pw), (0, 0)),
                 constant_values=-jnp.inf)
    # parity-phase split (cheap JAX slices) -> all kernel reads are unit-stride.
    ee = xp[:, 0::2, 0::2, :]
    eo = xp[:, 0::2, 1::2, :]
    oe = xp[:, 1::2, 0::2, :]
    oo = xp[:, 1::2, 1::2, :]
    in_specs = [pl.BlockSpec((None, oh + 1, ow + 1, c), lambda i: (i, 0, 0, 0))
                for _ in range(4)]
    return pl.pallas_call(
        _maxpool_kernel,
        out_shape=jax.ShapeDtypeStruct((n, oh, ow, c), x.dtype),
        grid_spec=pltpu.PrefetchScalarGridSpec(
            num_scalar_prefetch=0,
            grid=(n,),
            in_specs=in_specs,
            out_specs=pl.BlockSpec((None, oh, ow, c), lambda i: (i, 0, 0, 0))),
        compiler_params=pltpu.CompilerParams(dimension_semantics=("parallel",)),
    )(ee, eo, oe, oo)


# --------------------- fused global-avg-pool + Linear(2048 -> 1) -------------------

def _pool_fc_kernel(x_ref, w_ref, b_ref, o_ref):
    x = x_ref[...].astype(jnp.float32)                    # (H*W, C)
    pooled = jnp.mean(x, axis=0, keepdims=True)           # (1, C)
    y = jnp.sum(pooled * w_ref[...], axis=1, keepdims=True)   # (1, 1)
    o_ref[...] = y + b_ref[...]


@jax.jit
def pool_fc(x, w, b):
    # AdaptiveAvgPool2d((1,1)) + flatten + Linear(C -> 1)   ->  [N, 1] f32
    n, h, wd, c = x.shape
    x2 = x.reshape(n, h * wd, c)
    wr = w.reshape(1, c).astype(jnp.float32)
    br = b.reshape(1, 1).astype(jnp.float32)
    out = pl.pallas_call(
        _pool_fc_kernel,
        out_shape=jax.ShapeDtypeStruct((n, 1, 1), jnp.float32),
        grid_spec=pltpu.PrefetchScalarGridSpec(
            num_scalar_prefetch=0,
            grid=(n,),
            in_specs=[pl.BlockSpec((None, h * wd, c), lambda i: (i, 0, 0)),
                      pl.BlockSpec((1, c), lambda i: (0, 0)),
                      pl.BlockSpec((1, 1), lambda i: (0, 0))],
            out_specs=pl.BlockSpec((None, 1, 1), lambda i: (i, 0, 0))),
        compiler_params=pltpu.CompilerParams(dimension_semantics=("parallel",)),
    )(x2, wr, br)
    return out.reshape(n, 1)


# ----------------------------- parameter construction ------------------------------

def _he_conv(key, kh, kw, cin, cout):
    std = math.sqrt(2.0 / (kh * kw * cin))
    return (jax.random.normal(key, (kh, kw, cin, cout), jnp.float32) * std
            ).astype(jnp.bfloat16)


def _bn_folded(cout):
    # torch BatchNorm2d defaults (gamma=1, beta=0, running_mean=0, running_var=1),
    # folded into per-channel scale/bias applied in the matmul epilogue.
    scale = jnp.full((cout,), 1.0 / math.sqrt(1.0 + _BN_EPS), jnp.float32)
    bias = jnp.zeros((cout,), jnp.float32)
    return scale, bias


def init_resnet152_params(key):
    # resnet152: Bottleneck blocks [3, 8, 36, 3], expansion 4, fc replaced by (2048->1)
    cfg = [(64, 3, 1), (128, 8, 2), (256, 36, 2), (512, 3, 2)]
    expansion = 4
    cnt = [0]

    def nk():
        cnt[0] += 1
        return jax.random.fold_in(key, cnt[0])

    params = {}
    params["conv1_w"] = _he_conv(nk(), 7, 7, 3, 64)
    params["conv1_s"], params["conv1_b"] = _bn_folded(64)

    layers = []
    inplanes = 64
    for planes, nblocks, stride in cfg:
        blocks = []
        for bi in range(nblocks):
            s = stride if bi == 0 else 1
            blk = {"stride": s}
            blk["w1"] = _he_conv(nk(), 1, 1, inplanes, planes)
            blk["s1"], blk["b1"] = _bn_folded(planes)
            blk["w2"] = _he_conv(nk(), 3, 3, planes, planes)
            blk["s2"], blk["b2"] = _bn_folded(planes)
            blk["w3"] = _he_conv(nk(), 1, 1, planes, planes * expansion)
            blk["s3"], blk["b3"] = _bn_folded(planes * expansion)
            if s != 1 or inplanes != planes * expansion:
                blk["wd"] = _he_conv(nk(), 1, 1, inplanes, planes * expansion)
                blk["sd"], blk["bd"] = _bn_folded(planes * expansion)
            blocks.append(blk)
            inplanes = planes * expansion
        layers.append(blocks)
    params["layers"] = layers

    in_features = 512 * expansion                     # 2048 == net.fc.in_features
    params["fc_w"] = jax.random.normal(nk(), (in_features, 1), jnp.float32) * (
        1.0 / math.sqrt(in_features))
    params["fc_b"] = jnp.zeros((1,), jnp.float32)
    return params


# ------------------------------------ forward --------------------------------------

def _bottleneck(x, blk):
    s = blk["stride"]
    if s == 1 and "wd" not in blk:
        # fully fused single-kernel bottleneck (46 of the 50 blocks)
        return fused_bottleneck_s1(
            x, blk["w1"], blk["s1"], blk["b1"],
            blk["w2"], blk["s2"], blk["b2"],
            blk["w3"], blk["s3"], blk["b3"])
    # transition blocks (stride-2 and/or projection shortcut)
    out = conv_bn_act(x, blk["w1"], blk["s1"], blk["b1"], None,
                      stride=1, padding=0, relu=True)
    out = conv_bn_act(out, blk["w2"], blk["s2"], blk["b2"], None,
                      stride=s, padding=1, relu=True)
    identity = conv_bn_act(x, blk["wd"], blk["sd"], blk["bd"], None,
                           stride=s, padding=0, relu=False)
    # conv3 + bn3 + residual add + relu fused in one Pallas matmul epilogue
    return conv_bn_act(out, blk["w3"], blk["s3"], blk["b3"], identity,
                       stride=1, padding=0, relu=True)


def model_resnet_forward(params, img_nchw, text=None):
    # matches Model_Resnet.forward(img, text): `text` is ignored, output [N, 1].
    x = jnp.transpose(img_nchw.astype(jnp.float32), (0, 2, 3, 1))   # NCHW -> NHWC
    x = conv_bn_act(x, params["conv1_w"], params["conv1_s"], params["conv1_b"],
                    None, stride=2, padding=3, relu=True)
    x = maxpool_3x3_s2_p1(x)
    for blocks in params["layers"]:
        for blk in blocks:
            x = _bottleneck(x, blk)
    return pool_fc(x, params["fc_w"], params["fc_b"])               # [N, 1] f32


if __name__ == "__main__":
    key = jax.random.PRNGKey(0)
    params = init_resnet152_params(jax.random.fold_in(key, 1))
    # Small image consistent with the module (stem needs 3 channels); 64x64 keeps the
    # full resnet152 topology valid (final feature map 2x2 before global avg pool).
    img = jax.random.normal(jax.random.fold_in(key, 2), (2, 3, 64, 64), jnp.float32)
    text = jax.random.normal(jax.random.fold_in(key, 3), (2, 8), jnp.float32)  # ignored
    out = jax.block_until_ready(model_resnet_forward(params, img, text))
    assert out.shape == (2, 1) and out.dtype == jnp.float32
    print("KERNEL_OK")
</pallas_src>

<mosaic_0001>
module attributes {stable_mosaic.version = 11 : i64} {
  func.func @kernel(%arg0: i32, %arg1: i32, %arg2: memref<512x147xbf16, #tpu.memory_space<vmem>>, %arg3: memref<147x64xbf16, #tpu.memory_space<vmem>>, %arg4: memref<1x64xf32, #tpu.memory_space<vmem>>, %arg5: memref<1x64xf32, #tpu.memory_space<vmem>>, %arg6: memref<512x64xbf16, #tpu.memory_space<vmem>>) attributes {dimension_semantics = [#tpu.dimension_semantics<parallel>, #tpu.dimension_semantics<parallel>], iteration_bounds = array<i64: 4, 1>, scalar_prefetch = 0 : i64, scratch_operands = 0 : i64, tpu.core_type = #tpu.core_type<tc>, window_params = [{transform_indices = @transform_0, window_bounds = array<i64: 512, 147>}, {transform_indices = @transform_1, window_bounds = array<i64: 147, 64>}, {transform_indices = @transform_2, window_bounds = array<i64: 1, 64>}, {transform_indices = @transform_3, window_bounds = array<i64: 1, 64>}, {transform_indices = @transform_4, window_bounds = array<i64: 512, 64>}]} {
    %c0 = arith.constant 0 : index
    %c0_0 = arith.constant 0 : index
    %0 = vector.load %arg2[%c0, %c0_0] : memref<512x147xbf16, #tpu.memory_space<vmem>>, vector<512x147xbf16>
    %c0_1 = arith.constant 0 : index
    %c0_2 = arith.constant 0 : index
    %1 = vector.load %arg3[%c0_1, %c0_2] : memref<147x64xbf16, #tpu.memory_space<vmem>>, vector<147x64xbf16>
    %cst = arith.constant dense<0.000000e+00> : vector<512x64xf32>
    %2 = tpu.matmul %0, %1, %cst {dimension_numbers = #tpu.dot_dimension_numbers<[1], [0], [0], [1], [0, 0, 1, 1], [], []>} : vector<512x147xbf16>, vector<147x64xbf16>, vector<512x64xf32> -> vector<512x64xf32>
    %c0_3 = arith.constant 0 : index
    %c0_4 = arith.constant 0 : index
    %3 = vector.load %arg4[%c0_3, %c0_4] : memref<1x64xf32, #tpu.memory_space<vmem>>, vector<1x64xf32>
    %4 = vector.broadcast %3 : vector<1x64xf32> to vector<512x64xf32>
    %5 = arith.mulf %2, %4 : vector<512x64xf32>
    %c0_5 = arith.constant 0 : index
    %c0_6 = arith.constant 0 : index
    %6 = vector.load %arg5[%c0_5, %c0_6] : memref<1x64xf32, #tpu.memory_space<vmem>>, vector<1x64xf32>
    %7 = vector.broadcast %6 : vector<1x64xf32> to vector<512x64xf32>
    %8 = arith.addf %5, %7 : vector<512x64xf32>
    %cst_7 = arith.constant 0.000000e+00 : f32
    %9 = vector.broadcast %cst_7 : f32 to vector<512x64xf32>
    %10 = arith.maximumf %8, %9 : vector<512x64xf32>
    %11 = arith.truncf %10 : vector<512x64xf32> to vector<512x64xbf16>
    %c0_8 = arith.constant 0 : index
    %c0_9 = arith.constant 0 : index
    %12 = vector.load %arg6[%c0_8, %c0_9] : memref<512x64xbf16, #tpu.memory_space<vmem>>, vector<512x64xbf16>
    tpu.vector_store %arg6[%c0_8, %c0_9], %11 {strides = array<i32>} : memref<512x64xbf16, #tpu.memory_space<vmem>>, vector<512x64xbf16>,
    return
  }
  func.func @transform_0(%arg0: i32, %arg1: i32) -> (i32, i32) {
    %c0_i32 = arith.constant 0 : i32
    %c0_i32_0 = arith.constant 0 : i32
    return %arg0, %c0_i32 : i32, i32
  }
  func.func @transform_1(%arg0: i32, %arg1: i32) -> (i32, i32) {
    %c0_i32 = arith.constant 0 : i32
    %c0_i32_0 = arith.constant 0 : i32
    return %c0_i32, %arg1 : i32, i32
  }
  func.func @transform_2(%arg0: i32, %arg1: i32) -> (i32, i32) {
    %c0_i32 = arith.constant 0 : i32
    %c0_i32_0 = arith.constant 0 : i32
    return %c0_i32, %arg1 : i32, i32
  }
  func.func @transform_3(%arg0: i32, %arg1: i32) -> (i32, i32) {
    %c0_i32 = arith.constant 0 : i32
    %c0_i32_0 = arith.constant 0 : i32
    return %c0_i32, %arg1 : i32, i32
  }
  func.func @transform_4(%arg0: i32, %arg1: i32) -> (i32, i32) {
    %c0_i32 = arith.constant 0 : i32
    return %arg0, %arg1 : i32, i32
  }
}

</mosaic_0001>

<bundles_post_ra>
// kernel: conv_bn_act.1
= control target key start
LH: loop header
LB: loop body
LE: loop exit
PB: predicated region body
PF: predicated region fallthrough
CT: control target
= control target key end

     0   :  { %9 = vsyncpa [#allocation3], 0  ;;  %s2807_s0 = inlined_call_operand.vmem [shape: bf16[2048,147], index: 0, kind: input, shape index: {}]   ;;  %s2808_s1 = inlined_call_operand.vmem [shape: bf16[147,64], index: 1, kind: input, shape index: {}]   ;;  %s2809_s2 = inlined_call_operand.vmem [shape: f32[1,64], index: 2, kind: input, shape index: {}]   ;;  %s2810_s3 = inlined_call_operand.vmem [shape: f32[1,64], index: 3, kind: input, shape index: {}]   ;;  %s2811_s4 = inlined_call_operand.hbm [shape: bf16[2048,64], index: 4, kind: output, shape index: {}]  }
   0x1   :  { %11 = vsyncpa [#allocation3 + $0x1], 0  ;;  %s2185_s15 = smov 0   ;;  %s2187_s16 = smov 0  }
   0x2   :  { %s2189_s17 = smov 0   ;;  %s2191_s18 = smov 0  }
   0x3   :  { %s2193_s19 = smov 0   ;;  %s2195_s20 = smov 0  }
   0x4 LB: > { %s1589_s21 = sadd.s32 4294967295, %s2155_s20   ;;  %s1590_s22 = sadd.s32 4294967294, %s2155_s20   ;;  %s2155_s20 = sphi %s2195_s20, %s17_s20   ;;  %s2151_s19 = sphi %s2193_s19, %s2818_s19   ;;  %s2147_s18 = sphi %s2191_s18, %s2817_s18   ;;  %s2143_s17 = sphi %s2189_s17, %s2816_s17   ;;  %s2139_s16 = sphi %s2187_s16, %s2815_s16   ;;  %s2135_s15 = sphi %s2185_s15, %s2814_s15  }
   0x5   : > { %s29_s23 = sadd.s32 1, %s2151_s19  ;;  %s142_s24 = sadd.s32 1, %s2143_s17 }
   0x6   : > { %p31_p0 = scmp.ge.s32.totalorder %s29_s23, 4  ;;  %p152_p1 = scmp.ne.s32.totalorder %s2143_s17, %s2139_s16 }
   0x7   : > { %p153_p2 = scmp.eq.s32.totalorder %s1589_s21, 3  ;;  %p158_p3 = scmp.ne.s32.totalorder %s2139_s16, %s2135_s15 }
   0x8   : > { %s2820_s23 = smov (%p31_p0, %s29_s23), 0  ;;  %p159_p5 = scmp.eq.s32.totalorder %s1590_s22, 3 }
   0x9   : > { %p2225_p4 = por %p153_p2, %p152_p1  ;;  %s137_s26 = ssub.s32 %s2151_s19, %s2820_s23 }
   0xa   : > { %p1596_p6 = scmp.ge.s32.totalorder %s2155_s20, 1  ;;  %p140_p7 = scmp.eq.s32.totalorder %s137_s26, 0 }
   0xb   : > { %p2232_p8 = por %p159_p5, %p158_p3  ;;  %p206_p9 = scmp.lt.s32.totalorder %s2155_s20, 5 }
   0xc   : > { %s2238_s28 = scalar_select %p140_p7, %s2143_s17, %s142_s24  }
   0xd   : > { %p207_p10 = pnand %p1596_p6, %p206_p9 }
   0xe   : > { %s1598_s7 = sshll.u32 (!%p207_p10), %s2147_s18, 6  ;;  %s240_s22 = sand.u32 (!%p207_p10), 1, %s2139_s16  }
   0xf   : > { %210 = sbr.rel (%p207_p10) target bundleno = 446 (0x1be), region = 36  ;;  %p244_p11 = scmp.lt.s32.totalorder (!%p207_p10), %s1598_s7, 255 }
  0x10   : > { %s1597_s26 = sshll.u32 (!%p207_p10), %s240_s22, 8 }
  0x11   : > { %s2399_s29 = scalar_lea.vmem (!%p207_p10), [#allocation2], %s1597_s26 }
  0x14   : > { %v2002_v0 = vld [vmem:[%s2808_s1 + $0x38] sm:$0xff]  ;;  %v344_v1 = vld [vmem:[%s2808_s1 + $0x48] sm:$0x3]  ;;  %vm787_vm0 = vcmask 1040384   ;;  %vm788_vm1 = vcmask 1041408   ;;  %v2001_v3 = vld [vmem:[%s2808_s1 + $0x30] sm:$0xff] }
  0x15   : > { %v670_v2 = vunpack.c.l.b16 %v344_v1  ;;  %794 = vmatpush.bf16.msra.mxu0 %v2002_v0  ;;  %2005 = vmatpush.bf16.msra.mxu2 %v2002_v0  ;;  %v2157_v4 = vmov 65535   ;;  %s2822_s7 = smov (!%p244_p11, %s1598_s7), 255  ;;  %v2000_v9 = vld [vmem:[%s2808_s1 + $0x28] sm:$0xff]  ;;  %v2003_v10 = vld [vmem:[%s2808_s1 + $0x40] sm:$0xff]  ;;  %vm690_vm2 = vcmask 154624   ;;  %v1998_v18 = vld [vmem:[%s2808_s1 + $0x18] sm:$0xff] }
  0x16   : > { %v789_v5 = vsel %vm787_vm0, 4294967295, %v2157_v4  ;;  %s1930_s12 = sshll.u32 %s2822_s7, 3  ;;  %v1999_v14 = vld [vmem:[%s2808_s1 + $0x20] sm:$0xff]  ;;  %v1997_v19 = vld [vmem:[%s2808_s1 + $0x10] sm:$0xff]  ;;  %v1996_v20 = vld [vmem:[%s2808_s1 + $0x8] sm:$0xff]  ;;  %vm1396_vm3 = vcmask 519168  }
  0x17   : > { %v680_v6 = vpack.c.b16 %v670_v2, %v670_v2  ;;  %v790_v7 = vsel %vm788_vm1, %v789_v5, 0  ;;  %s2259_s24 = scalar_lea.vmem %s2807_s0, %s1930_s12  ;;  %v1995_v26 = vld [vmem:[%s2808_s1] sm:$0xff]  ;;  %s2004_s7 = sshll.u32 %s2147_s18, 8 }
  0x18   : > { %v1931_v11 = vld [vmem:[%s2259_s24 + $0x4] sm:$0xf]  ;;  %v1605_v12 = vld [vmem:[%s2259_s24 + $0x8] sm:$0xf0]  ;;  %v1965_v15 = vld [vmem:[%s2259_s24 + $0x114] sm:$0xf]  ;;  %s1474_s10 = scalar_lea.hbm %s2811_s4, %s2004_s7 }
  0x19   : > { %v792_v8 = vand.u32 %v790_v7, %v680_v6  ;;  %795 = vmatpush.bf16.msra.mxu0 %v2001_v3  ;;  %2006 = vmatpush.bf16.msra.mxu2 %v2001_v3  ;;  %v1608_v13 = vor.u32 %v1931_v11, %v1605_v12  ;;  %v1741_v16 = vld [vmem:[%s2259_s24 + $0x118] sm:$0xf0]  ;;  %v1933_v21 = vld [vmem:[%s2259_s24 + $0x14] sm:$0xf]  ;;  %v1967_v23 = vld [vmem:[%s2259_s24 + $0x124] sm:$0xf] }
  0x1a   : > { %v1744_v17 = vor.u32 %v1965_v15, %v1741_v16  ;;  %v1613_v22 = vld [vmem:[%s2259_s24 + $0x18] sm:$0xf0]  ;;  %v1749_v24 = vld [vmem:[%s2259_s24 + $0x128] sm:$0xf0]  ;;  %v1603_v27 = vld [vmem:[%s2259_s24] sm:$0xf] }
  0x1b   : > { %969 = vmatpush.bf16.msra.mxu1 %v792_v8  ;;  %2013 = vmatpush.bf16.msra.mxu3 %v792_v8  ;;  %v1616_v25 = vor.u32 %v1933_v21, %v1613_v22  ;;  %v1932_v28 = vld [vmem:[%s2259_s24 + $0x4] sm:$0xf0]  ;;  %v1731_v29 = vld [vmem:[%s2259_s24 + $0x100] sm:$0xf]  ;;  %v1752_v31 = vor.u32 %v1967_v23, %v1749_v24  ;;  %v1935_v34 = vld [vmem:[%s2259_s24 + $0x24] sm:$0xf] }
  0x1c   : > { %v1964_v30 = vld [vmem:[%s2259_s24 + $0x104] sm:$0xf0]  ;;  %v1604_v32 = vor.u32 %v1932_v28, %v1603_v27  ;;  %v1621_v35 = vld [vmem:[%s2259_s24 + $0x28] sm:$0xf0]  ;;  %v1969_v36 = vld [vmem:[%s2259_s24 + $0x134] sm:$0xf] }
  0x1d   : > { %796 = vmatpush.bf16.msra.mxu0 %v2000_v9  ;;  %2007 = vmatpush.bf16.msra.mxu2 %v2000_v9  ;;  %v1732_v33 = vor.u32 %v1964_v30, %v1731_v29  ;;  %v1757_v37 = vld [vmem:[%s2259_s24 + $0x138] sm:$0xf0]  ;;  %v1624_v38 = vor.u32 %v1935_v34, %v1621_v35  ;;  %v1611_v39 = vld [vmem:[%s2259_s24 + $0x10] sm:$0xf]  ;;  %v1934_v40 = vld [vmem:[%s2259_s24 + $0x14] sm:$0xf0] }
  0x1e   : > { %v1739_v41 = vld [vmem:[%s2259_s24 + $0x110] sm:$0xf]  ;;  %v1966_v42 = vld [vmem:[%s2259_s24 + $0x114] sm:$0xf0]  ;;  %v1760_v43 = vor.u32 %v1969_v36, %v1757_v37  ;;  %v1612_v44 = vor.u32 %v1934_v40, %v1611_v39  ;;  %v1937_v46 = vld [vmem:[%s2259_s24 + $0x34] sm:$0xf] }
  0x1f   : > { %970 = vmatpush.bf16.msra.mxu1 %v2003_v10  ;;  %2014 = vmatpush.bf16.msra.mxu3 %v2003_v10  ;;  %v1740_v45 = vor.u32 %v1966_v42, %v1739_v41  ;;  %v1629_v47 = vld [vmem:[%s2259_s24 + $0x38] sm:$0xf0]  ;;  %v1971_v48 = vld [vmem:[%s2259_s24 + $0x144] sm:$0xf]  ;;  %v1765_v49 = vld [vmem:[%s2259_s24 + $0x148] sm:$0xf0] }
  0x20   : > { %v1632_v50 = vor.u32 %v1937_v46, %v1629_v47  ;;  %v1619_v51 = vld [vmem:[%s2259_s24 + $0x20] sm:$0xf]  ;;  %v1936_v52 = vld [vmem:[%s2259_s24 + $0x24] sm:$0xf0]  ;;  %v1768_v55 = vor.u32 %v1971_v48, %v1765_v49  ;;  %v1939_v58 = vld [vmem:[%s2259_s24 + $0x44] sm:$0xf] }
  0x21   : > { %797 = vmatpush.bf16.msra.mxu0 %v1999_v14  ;;  %2008 = vmatpush.bf16.msra.mxu2 %v1999_v14  ;;  %v1747_v53 = vld [vmem:[%s2259_s24 + $0x120] sm:$0xf]  ;;  %v1968_v54 = vld [vmem:[%s2259_s24 + $0x124] sm:$0xf0]  ;;  %v1620_v56 = vor.u32 %v1936_v52, %v1619_v51  ;;  %v1637_v59 = vld [vmem:[%s2259_s24 + $0x48] sm:$0xf0] }
  0x22   : > { %1893 = vmatmul.msk.bf16.vlgmr.msra.gmra.mxu1 %vm690_vm2, %v1608_v13  ;;  %1910 = vmatmul.msk.bf16.vlgmr.msra.gmra.mxu3 %vm690_vm2, %v1744_v17  ;;  %v1748_v57 = vor.u32 %v1968_v54, %v1747_v53  ;;  %v1973_v60 = vld [vmem:[%s2259_s24 + $0x154] sm:$0xf]  ;;  %v1773_v61 = vld [vmem:[%s2259_s24 + $0x158] sm:$0xf0]  ;;  %v1640_v62 = vor.u32 %v1939_v58, %v1637_v59  ;;  %v1627_v63 = vld [vmem:[%s2259_s24 + $0x30] sm:$0xf] }
  0x23   : > { %v1938_v0 = vld [vmem:[%s2259_s24 + $0x34] sm:$0xf0]  ;;  %v1755_v1 = vld [vmem:[%s2259_s24 + $0x130] sm:$0xf]  ;;  %v1776_v3 = vor.u32 %v1973_v60, %v1773_v61  ;;  %v1941_v6 = vld [vmem:[%s2259_s24 + $0x54] sm:$0xf] }
  0x24   : > { %v1970_v2 = vld [vmem:[%s2259_s24 + $0x134] sm:$0xf0]  ;;  %v1628_v4 = vor.u32 %v1938_v0, %v1627_v63  ;;  %v1645_v7 = vld [vmem:[%s2259_s24 + $0x58] sm:$0xf0]  ;;  %v1975_v8 = vld [vmem:[%s2259_s24 + $0x164] sm:$0xf] }
  0x25   : > { %798 = vmatpush.bf16.msra.mxu0 %v1998_v18  ;;  %2009 = vmatpush.bf16.msra.mxu2 %v1998_v18  ;;  %v1756_v5 = vor.u32 %v1970_v2, %v1755_v1  ;;  %v1781_v9 = vld [vmem:[%s2259_s24 + $0x168] sm:$0xf0]  ;;  %v1648_v10 = vor.u32 %v1941_v6, %v1645_v7  ;;  %v1635_v11 = vld [vmem:[%s2259_s24 + $0x40] sm:$0xf]  ;;  %v1940_v12 = vld [vmem:[%s2259_s24 + $0x44] sm:$0xf0] }
  0x26   : > { %v1763_v13 = vld [vmem:[%s2259_s24 + $0x140] sm:$0xf]  ;;  %v1972_v14 = vld [vmem:[%s2259_s24 + $0x144] sm:$0xf0]  ;;  %v1784_v15 = vor.u32 %v1975_v8, %v1781_v9  ;;  %v1636_v16 = vor.u32 %v1940_v12, %v1635_v11  ;;  %v1943_v18 = vld [vmem:[%s2259_s24 + $0x64] sm:$0xf] }
  0x27   : > { %v1764_v17 = vor.u32 %v1972_v14, %v1763_v13  ;;  %v1789_v21 = vld [vmem:[%s2259_s24 + $0x178] sm:$0xf0]  ;;  %v1643_v23 = vld [vmem:[%s2259_s24 + $0x50] sm:$0xf]  ;;  %v1942_v24 = vld [vmem:[%s2259_s24 + $0x54] sm:$0xf0] }
  0x28   : > { %v1644_v28 = vor.u32 %v1942_v24, %v1643_v23  ;;  %v1945_v30 = vld [vmem:[%s2259_s24 + $0x74] sm:$0xf]  ;;  %v1651_v35 = vld [vmem:[%s2259_s24 + $0x60] sm:$0xf]  ;;  %v1944_v36 = vld [vmem:[%s2259_s24 + $0x64] sm:$0xf0] }
  0x29   : > { %799 = vmatpush.bf16.msra.mxu0 %v1997_v19  ;;  %2010 = vmatpush.bf16.msra.mxu2 %v1997_v19  ;;  %v1653_v19 = vld [vmem:[%s2259_s24 + $0x68] sm:$0xf0]  ;;  %v1779_v37 = vld [vmem:[%s2259_s24 + $0x160] sm:$0xf]  ;;  %v1652_v40 = vor.u32 %v1944_v36, %v1651_v35  ;;  %v1947_v42 = vld [vmem:[%s2259_s24 + $0x84] sm:$0xf] }
  0x2a   : > { %v1656_v22 = vor.u32 %v1943_v18, %v1653_v19  ;;  %v1659_v47 = vld [vmem:[%s2259_s24 + $0x70] sm:$0xf]  ;;  %v1946_v48 = vld [vmem:[%s2259_s24 + $0x74] sm:$0xf0]  ;;  %v1677_v58 = vld [vmem:[%s2259_s24 + $0x98] sm:$0xf0] }
  0x2b   : > { %v1978_v51 = vld [vmem:[%s2259_s24 + $0x174] sm:$0xf0]  ;;  %v1660_v53 = vor.u32 %v1946_v48, %v1659_v47  ;;  %v1983_v59 = vld [vmem:[%s2259_s24 + $0x1a4] sm:$0xf]  ;;  %v1813_v60 = vld [vmem:[%s2259_s24 + $0x1a8] sm:$0xf0] }
  0x2c   : > { %v1948_v63 = vld [vmem:[%s2259_s24 + $0x84] sm:$0xf0]  ;;  %v1795_v2 = vld [vmem:[%s2259_s24 + $0x180] sm:$0xf]  ;;  %v1821_v23 = vld [vmem:[%s2259_s24 + $0x1b8] sm:$0xf0] }
  0x2d   : > { %800 = vmatpush.bf16.msra.mxu0 %v1996_v20  ;;  %2011 = vmatpush.bf16.msra.mxu2 %v1996_v20  ;;  %v1977_v20 = vld [vmem:[%s2259_s24 + $0x174] sm:$0xf]  ;;  %s1475_s18 = sshll.u32 %s2399_s29, 4  ;;  %s1477_s11 = sshll.u32 %s1474_s10, 4  ;;  %s1476_s18 = int_to_ptr.vmem [resolvable:$true] %s1475_s18  ;;  %s1478_s11 = int_to_ptr.hbm [resolvable:$true] %s1477_s11 }
  0x2e   : > { %v1792_v27 = vor.u32 %v1977_v20, %v1789_v21  ;;  %v1951_v20 = vld [vmem:[%s2259_s24 + $0xa4] sm:$0xf]  ;;  %v1685_v21 = vld [vmem:[%s2259_s24 + $0xa8] sm:$0xf0]  ;;  %s1462_s12 = scalar_lea.sflag [#allocation3], %s240_s22  ;;  %s2091_s13 = sshra.s32 %s1478_s11, 4  ;;  %s2092_s13 = int_to_ptr.hbm [resolvable:$true] %s2091_s13 }
  0x2f   : > { %s2093_s14 = scalar_lea.hbm %s2092_s13, 256  ;;  %p2098_p1 = scmp.lt.s32.totalorder %s2092_s13, %s2811_s4 }
  0x30   : > { %p2094_p12 = scmp.ne.s32.totalorder %s2092_s13, %s2093_s14 }
  0x31   : > { %801 = vmatpush.bf16.msra.mxu0 %v1995_v26  ;;  %2012 = vmatpush.bf16.msra.mxu2 %v1995_v26  ;;  %v1974_v26 = vld [vmem:[%s2259_s24 + $0x154] sm:$0xf0] }
  0x32   : > { %1894 = vmatmul.msk.bf16.gmra.mxu1 %vm690_vm2, %v1616_v25  ;;  %1911 = vmatmul.msk.bf16.gmra.mxu3 %vm690_vm2, %v1752_v31  ;;  %v1771_v25 = vld [vmem:[%s2259_s24 + $0x150] sm:$0xf]  ;;  %v1661_v31 = vld [vmem:[%s2259_s24 + $0x78] sm:$0xf0]  ;;  %p2095_p13 = pnand %p2094_p12, %p2225_p4 }
  0x33   : > { %v1772_v29 = vor.u32 %v1974_v26, %v1771_v25  ;;  %v1664_v34 = vor.u32 %v1945_v30, %v1661_v31  ;;  %v1688_v25 = vor.u32 %v1951_v20, %v1685_v21  ;;  %v1675_v26 = vld [vmem:[%s2259_s24 + $0x90] sm:$0xf] }
  0x34   : > { %802 = vmatmul.bf16.vlgmr.msra.gmra.mxu0 %v1604_v32  ;;  %882 = vmatmul.bf16.vlgmr.msra.gmra.mxu2 %v1732_v33  ;;  %v1979_v32 = vld [vmem:[%s2259_s24 + $0x184] sm:$0xf]  ;;  %v1797_v33 = vld [vmem:[%s2259_s24 + $0x188] sm:$0xf0]  ;;  %v1803_v31 = vld [vmem:[%s2259_s24 + $0x190] sm:$0xf]  ;;  %p2096_p0 = pneg %p2095_p13 }
  0x35   : > { %v1800_v39 = vor.u32 %v1979_v32, %v1797_v33  ;;  %v1982_v32 = vld [vmem:[%s2259_s24 + $0x194] sm:$0xf0] }
  0x42   : > { %1895 = vmatmul.msk.bf16.gmra.mxu1 %vm690_vm2, %v1624_v38  ;;  %1912 = vmatmul.msk.bf16.gmra.mxu3 %vm690_vm2, %v1760_v43  ;;  %v1976_v38 = vld [vmem:[%s2259_s24 + $0x164] sm:$0xf0]  ;;  %v1669_v43 = vld [vmem:[%s2259_s24 + $0x88] sm:$0xf0] }
  0x43   : > { %v1780_v41 = vor.u32 %v1976_v38, %v1779_v37  ;;  %v1672_v46 = vor.u32 %v1947_v42, %v1669_v43  ;;  %v1804_v38 = vor.u32 %v1982_v32, %v1803_v31  ;;  %v1955_v32 = vld [vmem:[%s2259_s24 + $0xc4] sm:$0xf] }
  0x44   : > { %807 = vmatmul.bf16.gmra.mxu0 %v1612_v44  ;;  %887 = vmatmul.bf16.gmra.mxu2 %v1740_v45  ;;  %v1981_v44 = vld [vmem:[%s2259_s24 + $0x194] sm:$0xf]  ;;  %v1805_v45 = vld [vmem:[%s2259_s24 + $0x198] sm:$0xf0] }
  0x45   : > { %v1808_v52 = vor.u32 %v1981_v44, %v1805_v45 }
  0x52   : > { %1896 = vmatmul.msk.bf16.gmra.mxu1 %vm690_vm2, %v1632_v50  ;;  %1913 = vmatmul.msk.bf16.gmra.mxu3 %vm690_vm2, %v1768_v55  ;;  %v1787_v50 = vld [vmem:[%s2259_s24 + $0x170] sm:$0xf] }
  0x53   : > { %v1788_v54 = vor.u32 %v1978_v51, %v1787_v50  ;;  %v1953_v51 = vld [vmem:[%s2259_s24 + $0xb4] sm:$0xf] }
  0x54   : > { %812 = vmatmul.bf16.gmra.mxu0 %v1620_v56  ;;  %892 = vmatmul.bf16.gmra.mxu2 %v1748_v57  ;;  %v1949_v57 = vld [vmem:[%s2259_s24 + $0x94] sm:$0xf] }
  0x55   : > { %v1680_v61 = vor.u32 %v1949_v57, %v1677_v58 }
  0x62   : > { %1897 = vmatmul.msk.bf16.gmra.mxu1 %vm690_vm2, %v1640_v62  ;;  %1914 = vmatmul.msk.bf16.gmra.mxu3 %vm690_vm2, %v1776_v3  ;;  %v1667_v62 = vld [vmem:[%s2259_s24 + $0x80] sm:$0xf]  ;;  %v1980_v3 = vld [vmem:[%s2259_s24 + $0x184] sm:$0xf0] }
  0x63   : > { %v1668_v6 = vor.u32 %v1948_v63, %v1667_v62  ;;  %v1796_v8 = vor.u32 %v1980_v3, %v1795_v2  ;;  %v1984_v2 = vld [vmem:[%s2259_s24 + $0x1a4] sm:$0xf0] }
  0x64   : > { %817 = vmatmul.bf16.gmra.mxu0 %v1628_v4  ;;  %897 = vmatmul.bf16.gmra.mxu2 %v1756_v5  ;;  %v1816_v4 = vor.u32 %v1983_v59, %v1813_v60  ;;  %v2377_v5 = vld [vmem:[%s2809_s2] ss:$0 sm:$0xff] }
  0x65   : > { %v1683_v60 = vld [vmem:[%s2259_s24 + $0xa0] sm:$0xf] }
  0x72   : > { %1898 = vmatmul.msk.bf16.gmra.mxu1 %vm690_vm2, %v1648_v10  ;;  %1915 = vmatmul.msk.bf16.gmra.mxu3 %vm690_vm2, %v1784_v15  ;;  %v2383_v10 = vld [vmem:[%s2810_s3] ss:$0 sm:$0xff] }
  0x74   : > { %822 = vmatmul.bf16.gmra.mxu0 %v1636_v16  ;;  %902 = vmatmul.bf16.gmra.mxu2 %v1764_v17 }
  0x82   : > { %1899 = vmatmul.msk.bf16.gmra.mxu1 %vm690_vm2, %v1656_v22  ;;  %1916 = vmatmul.msk.bf16.gmra.mxu3 %vm690_vm2, %v1792_v27  ;;  %v1985_v22 = vld [vmem:[%s2259_s24 + $0x1b4] sm:$0xf]  ;;  %v1950_v27 = vld [vmem:[%s2259_s24 + $0x94] sm:$0xf0] }
  0x83   : > { %v1824_v33 = vor.u32 %v1985_v22, %v1821_v23  ;;  %v1676_v36 = vor.u32 %v1950_v27, %v1675_v26 }
  0x84   : > { %827 = vmatmul.bf16.gmra.mxu0 %v1644_v28  ;;  %907 = vmatmul.bf16.gmra.mxu2 %v1772_v29 }
  0x92   : > { %1900 = vmatmul.msk.bf16.gmra.mxu1 %vm690_vm2, %v1664_v34  ;;  %1917 = vmatmul.msk.bf16.gmra.mxu3 %vm690_vm2, %v1800_v39 }
  0x94   : > { %832 = vmatmul.bf16.gmra.mxu0 %v1652_v40  ;;  %912 = vmatmul.bf16.gmra.mxu2 %v1780_v41 }
  0x9f   : > { %v972_v49 = vpop.f32.mrf.mxu1 }
  0xa2   : > { %1901 = vmatmul.msk.bf16.gmra.mxu1 %vm690_vm2, %v1672_v46  ;;  %1918 = vmatmul.msk.bf16.gmra.mxu3 %vm690_vm2, %v1808_v52  ;;  %v1693_v52 = vld [vmem:[%s2259_s24 + $0xb8] sm:$0xf0] }
  0xa3   : > { %v1696_v59 = vor.u32 %v1953_v51, %v1693_v52 }
  0xa4   : > { %837 = vmatmul.bf16.gmra.mxu0 %v1660_v53  ;;  %917 = vmatmul.bf16.gmra.mxu2 %v1788_v54  ;;  %v1987_v54 = vld [vmem:[%s2259_s24 + $0x1c4] sm:$0xf] }
  0xa5   : > { %v2362_v55 = vpop.f32.mrf.mxu3 }
  0xa7   : > { %v974_v56 = vpop.f32.mrf.mxu1 }
  0xad   : > { %v2370_v0 = vpop.f32.mrf.mxu3 }
  0xaf   : > { %v977_v1 = vpop.f32.mrf.mxu1 }
  0xb1   : > { %v803_v7 = vpop.f32.mrf.mxu0 }
  0xb2   : > { %1902 = vmatmul.msk.bf16.gmra.mxu1 %vm690_vm2, %v1680_v61  ;;  %v973_v9 = vadd.f32 %v972_v49, %v803_v7  ;;  %1919 = vmatmul.msk.bf16.gmra.mxu3 %vm690_vm2, %v1816_v4 }
  0xb4   : > { %v1136_v11 = vmul.f32 %v2377_v5, %v973_v9  ;;  %842 = vmatmul.bf16.gmra.mxu0 %v1668_v6  ;;  %922 = vmatmul.bf16.gmra.mxu2 %v1796_v8 }
  0xb5   : > { %v2388_v12 = vpop.f32.mrf.mxu3 }
  0xb6   : > { %v1204_v13 = vadd.f32 %v2383_v10, %v1136_v11 }
  0xb7   : > { %v979_v14 = vpop.f32.mrf.mxu1  ;;  %v2393_v16 = vpop.f32.mrf.mxu2 }
  0xb8   : > { %v1268_v15 = vmax.f32 %v1204_v13, 0.0 }
  0xb9   : > { %v805_v17 = vpop.f32.mrf.mxu0 }
  0xba   : > { %v1332_v18 = vpack.c.bf16 %v1268_v15, %v1268_v15  ;;  %v975_v19 = vadd.f32 %v974_v56, %v805_v17  ;;  %v1829_v56 = vld [vmem:[%s2259_s24 + $0x1c8] sm:$0xf0] }
  0xbb   : > { %v1832_v3 = vor.u32 %v1987_v54, %v1829_v56 }
  0xbc   : > { %1397 = vst.msk [vmem:[%s2399_s29] sm:$0xf] %vm1396_vm3, %v1332_v18  ;;  %v1137_v24 = vmul.f32 %v2377_v5, %v975_v19 }
  0xbd   : > { %v2406_v28 = vpop.f32.mrf.mxu3 }
  0xbe   : > { %v1205_v29 = vadd.f32 %v2383_v10, %v1137_v24 }
  0xbf   : > { %v982_v30 = vpop.f32.mrf.mxu1  ;;  %v2411_v35 = vpop.f32.mrf.mxu2 }
  0xc0   : > { %v1269_v34 = vmax.f32 %v1205_v29, 0.0 }
  0xc1   : > { %v808_v37 = vpop.f32.mrf.mxu0 }
  0xc2   : > { %1903 = vmatmul.msk.bf16.gmra.mxu1 %vm690_vm2, %v1688_v25  ;;  %v1333_v39 = vpack.c.bf16 %v1269_v34, %v1269_v34  ;;  %v978_v40 = vadd.f32 %v977_v1, %v808_v37  ;;  %1920 = vmatmul.msk.bf16.gmra.mxu3 %vm690_vm2, %v1824_v33  ;;  %v1811_v1 = vld [vmem:[%s2259_s24 + $0x1a0] sm:$0xf]  ;;  %v1701_v33 = vld [vmem:[%s2259_s24 + $0xc8] sm:$0xf0]  ;;  %v1837_v37 = vld [vmem:[%s2259_s24 + $0x1d8] sm:$0xf0] }
  0xc4   : > { %1398 = vst.msk [vmem:[%s2399_s29 + $0x4] sm:$0xf] %vm1396_vm3, %v1333_v39  ;;  %v1138_v41 = vmul.f32 %v2377_v5, %v978_v40  ;;  %847 = vmatmul.bf16.gmra.mxu0 %v1676_v36  ;;  %927 = vmatmul.bf16.gmra.mxu2 %v1804_v38  ;;  %v1989_v36 = vld [vmem:[%s2259_s24 + $0x1d4] sm:$0xf]  ;;  %v1691_v40 = vld [vmem:[%s2259_s24 + $0xb0] sm:$0xf] }
  0xc5   : > { %v2418_v42 = vpop.f32.mrf.mxu3 }
  0xc6   : > { %v1206_v43 = vadd.f32 %v2383_v10, %v1138_v41  ;;  %v1954_v41 = vld [vmem:[%s2259_s24 + $0xb4] sm:$0xf0] }
  0xc7   : > { %v984_v44 = vpop.f32.mrf.mxu1  ;;  %v888_v46 = vpop.f32.mrf.mxu2  ;;  %v1692_v52 = vor.u32 %v1954_v41, %v1691_v40 }
  0xc8   : > { %v1270_v45 = vmax.f32 %v1206_v43, 0.0  ;;  %v1058_v47 = vadd.f32 %v2362_v55, %v888_v46  ;;  %v1952_v55 = vld [vmem:[%s2259_s24 + $0xa4] sm:$0xf0]  ;;  %v1819_v46 = vld [vmem:[%s2259_s24 + $0x1b0] sm:$0xf] }
  0xc9   : > { %v810_v48 = vpop.f32.mrf.mxu0  ;;  %v1684_v8 = vor.u32 %v1952_v55, %v1683_v60 }
  0xca   : > { %v1334_v49 = vpack.c.bf16 %v1270_v45, %v1270_v45  ;;  %v980_v50 = vadd.f32 %v979_v14, %v810_v48  ;;  %v1170_v53 = vmul.f32 %v2377_v5, %v1058_v47  ;;  %v1812_v14 = vor.u32 %v1984_v2, %v1811_v1  ;;  %v1986_v47 = vld [vmem:[%s2259_s24 + $0x1b4] sm:$0xf0] }
  0xcb   : > { %v1840_v48 = vor.u32 %v1989_v36, %v1837_v37 }
  0xcc   : > { %1399 = vst.msk [vmem:[%s2399_s29 + $0x8] sm:$0xf] %vm1396_vm3, %v1334_v49  ;;  %v1139_v57 = vmul.f32 %v2377_v5, %v980_v50  ;;  %v1238_v58 = vadd.f32 %v2383_v10, %v1170_v53 }
  0xcd   : > { %v2433_v61 = vpop.f32.mrf.mxu3 }
  0xce   : > { %v1207_v62 = vadd.f32 %v2383_v10, %v1139_v57  ;;  %v1302_v4 = vmax.f32 %v1238_v58, 0.0  ;;  %v1820_v57 = vor.u32 %v1986_v47, %v1819_v46 }
  0xcf   : > { %v987_v63 = vpop.f32.mrf.mxu1  ;;  %v890_v7 = vpop.f32.mrf.mxu2 }
  0xd0   : > { %v1271_v6 = vmax.f32 %v1207_v62, 0.0  ;;  %v1366_v9 = vpack.c.bf16 %v1302_v4, %v1302_v4  ;;  %v1060_v11 = vadd.f32 %v2370_v0, %v890_v7 }
  0xd1   : > { %v813_v13 = vpop.f32.mrf.mxu0 }
  0xd2   : > { %1904 = vmatmul.msk.bf16.gmra.mxu1 %vm690_vm2, %v1696_v59  ;;  %v1335_v15 = vpack.c.bf16 %v1271_v6, %v1271_v6  ;;  %v983_v17 = vadd.f32 %v982_v30, %v813_v13  ;;  %1921 = vmatmul.msk.bf16.gmra.mxu3 %vm690_vm2, %v1832_v3  ;;  %1431 = vst.msk [vmem:[%s2399_s29 + $0x88] sm:$0xf] %vm1396_vm3, %v1366_v9  ;;  %v1957_v13 = vld [vmem:[%s2259_s24 + $0xd4] sm:$0xf] }
  0xd3   : > { %v1171_v18 = vmul.f32 %v2377_v5, %v1060_v11 }
  0xd4   : > { %1400 = vst.msk [vmem:[%s2399_s29 + $0xc] sm:$0xf] %vm1396_vm3, %v1335_v15  ;;  %v1140_v19 = vmul.f32 %v2377_v5, %v983_v17  ;;  %852 = vmatmul.bf16.gmra.mxu0 %v1684_v8  ;;  %932 = vmatmul.bf16.gmra.mxu2 %v1812_v14  ;;  %v1709_v14 = vld [vmem:[%s2259_s24 + $0xd8] sm:$0xf0]  ;;  %v1991_v17 = vld [vmem:[%s2259_s24 + $0x1e4] sm:$0xf] }
  0xd5   : > { %v1239_v0 = vadd.f32 %v2383_v10, %v1171_v18  ;;  %v2448_v20 = vpop.f32.mrf.mxu3  ;;  %v1845_v18 = vld [vmem:[%s2259_s24 + $0x1e8] sm:$0xf0] }
  0xd6   : > { %v1208_v21 = vadd.f32 %v2383_v10, %v1140_v19 }
  0xd7   : > { %v989_v22 = vpop.f32.mrf.mxu1  ;;  %v1303_v23 = vmax.f32 %v1239_v0, 0.0  ;;  %v893_v25 = vpop.f32.mrf.mxu2 }
  0xd8   : > { %v1272_v24 = vmax.f32 %v1208_v21, 0.0  ;;  %v1063_v27 = vadd.f32 %v2388_v12, %v893_v25  ;;  %v1704_v12 = vor.u32 %v1955_v32, %v1701_v33  ;;  %v1699_v21 = vld [vmem:[%s2259_s24 + $0xc0] sm:$0xf] }
  0xd9   : > { %v1367_v26 = vpack.c.bf16 %v1303_v23, %v1303_v23  ;;  %v815_v29 = vpop.f32.mrf.mxu0  ;;  %v1956_v23 = vld [vmem:[%s2259_s24 + $0xc4] sm:$0xf0] }
  0xda   : > { %v1336_v30 = vpack.c.bf16 %v1272_v24, %v1272_v24  ;;  %v985_v31 = vadd.f32 %v984_v44, %v815_v29  ;;  %v1172_v34 = vmul.f32 %v2377_v5, %v1063_v27  ;;  %v1988_v27 = vld [vmem:[%s2259_s24 + $0x1c4] sm:$0xf0]  ;;  %v1848_v29 = vor.u32 %v1991_v17, %v1845_v18 }
  0xdb   : > { %1432 = vst.msk [vmem:[%s2399_s29 + $0x8c] sm:$0xf] %vm1396_vm3, %v1367_v26  ;;  %v1827_v26 = vld [vmem:[%s2259_s24 + $0x1c0] sm:$0xf]  ;;  %v1700_v33 = vor.u32 %v1956_v23, %v1699_v21 }
  0xdc   : > { %1401 = vst.msk [vmem:[%s2399_s29 + $0x10] sm:$0xf] %vm1396_vm3, %v1336_v30  ;;  %v1141_v38 = vmul.f32 %v2377_v5, %v985_v31  ;;  %v1240_v39 = vadd.f32 %v2383_v10, %v1172_v34 }
  0xdd   : > { %v2465_v43 = vpop.f32.mrf.mxu3 }
  0xde   : > { %v1209_v44 = vadd.f32 %v2383_v10, %v1141_v38  ;;  %v1304_v49 = vmax.f32 %v1240_v39, 0.0  ;;  %v1828_v38 = vor.u32 %v1988_v27, %v1827_v26 }
  0xdf   : > { %v992_v45 = vpop.f32.mrf.mxu1  ;;  %v895_v51 = vpop.f32.mrf.mxu2 }
  0xe0   : > { %v1273_v50 = vmax.f32 %v1209_v44, 0.0  ;;  %v1368_v53 = vpack.c.bf16 %v1304_v49, %v1304_v49  ;;  %v1065_v54 = vadd.f32 %v2406_v28, %v895_v51 }
  0xe1   : > { %v818_v56 = vpop.f32.mrf.mxu0 }
  0xe2   : > { %1905 = vmatmul.msk.bf16.gmra.mxu1 %vm690_vm2, %v1704_v12  ;;  %v1337_v58 = vpack.c.bf16 %v1273_v50, %v1273_v50  ;;  %v988_v59 = vadd.f32 %v987_v63, %v818_v56  ;;  %1922 = vmatmul.msk.bf16.gmra.mxu3 %vm690_vm2, %v1840_v48  ;;  %1433 = vst.msk [vmem:[%s2399_s29 + $0x90] sm:$0xf] %vm1396_vm3, %v1368_v53  ;;  %v1959_v56 = vld [vmem:[%s2259_s24 + $0xe4] sm:$0xf] }
  0xe3   : > { %v1173_v60 = vmul.f32 %v2377_v5, %v1065_v54 }
  0xe4   : > { %1402 = vst.msk [vmem:[%s2399_s29 + $0x14] sm:$0xf] %vm1396_vm3, %v1337_v58  ;;  %v1142_v55 = vmul.f32 %v2377_v5, %v988_v59  ;;  %857 = vmatmul.bf16.gmra.mxu0 %v1692_v52  ;;  %937 = vmatmul.bf16.gmra.mxu2 %v1820_v57  ;;  %v1717_v57 = vld [vmem:[%s2259_s24 + $0xe8] sm:$0xf0]  ;;  %v1993_v59 = vld [vmem:[%s2259_s24 + $0x1f4] sm:$0xf] }
  0xe5   : > { %v1241_v28 = vadd.f32 %v2383_v10, %v1173_v60  ;;  %v2480_v62 = vpop.f32.mrf.mxu3  ;;  %v1853_v60 = vld [vmem:[%s2259_s24 + $0x1f8] sm:$0xf0] }
  0xe6   : > { %v1210_v63 = vadd.f32 %v2383_v10, %v1142_v55 }
  0xe7   : > { %v994_v1 = vpop.f32.mrf.mxu1  ;;  %v1305_v2 = vmax.f32 %v1241_v28, 0.0  ;;  %v898_v4 = vpop.f32.mrf.mxu2 }
  0xe8   : > { %v1274_v3 = vmax.f32 %v1210_v63, 0.0  ;;  %v1068_v7 = vadd.f32 %v2418_v42, %v898_v4  ;;  %v1712_v42 = vor.u32 %v1957_v13, %v1709_v14  ;;  %v1707_v63 = vld [vmem:[%s2259_s24 + $0xd0] sm:$0xf] }
  0xe9   : > { %v1369_v6 = vpack.c.bf16 %v1305_v2, %v1305_v2  ;;  %v820_v8 = vpop.f32.mrf.mxu0  ;;  %v1958_v2 = vld [vmem:[%s2259_s24 + $0xd4] sm:$0xf0] }
  0xea   : > { %v1338_v9 = vpack.c.bf16 %v1274_v3, %v1274_v3  ;;  %v990_v11 = vadd.f32 %v989_v22, %v820_v8  ;;  %v1174_v15 = vmul.f32 %v2377_v5, %v1068_v7  ;;  %v1990_v7 = vld [vmem:[%s2259_s24 + $0x1d4] sm:$0xf0]  ;;  %v1856_v8 = vor.u32 %v1993_v59, %v1853_v60 }
  0xeb   : > { %1434 = vst.msk [vmem:[%s2399_s29 + $0x94] sm:$0xf] %vm1396_vm3, %v1369_v6  ;;  %v1835_v6 = vld [vmem:[%s2259_s24 + $0x1d0] sm:$0xf]  ;;  %v1708_v14 = vor.u32 %v1958_v2, %v1707_v63 }
  0xec   : > { %1403 = vst.msk [vmem:[%s2399_s29 + $0x18] sm:$0xf] %vm1396_vm3, %v1338_v9  ;;  %v1143_v19 = vmul.f32 %v2377_v5, %v990_v11  ;;  %v1242_v0 = vadd.f32 %v2383_v10, %v1174_v15 }
  0xed   : > { %v2497_v22 = vpop.f32.mrf.mxu3 }
  0xee   : > { %v1211_v24 = vadd.f32 %v2383_v10, %v1143_v19  ;;  %v1306_v30 = vmax.f32 %v1242_v0, 0.0  ;;  %v1836_v19 = vor.u32 %v1990_v7, %v1835_v6 }
  0xef   : > { %v997_v25 = vpop.f32.mrf.mxu1  ;;  %v900_v32 = vpop.f32.mrf.mxu2 }
  0xf0   : > { %v1275_v31 = vmax.f32 %v1211_v24, 0.0  ;;  %v1370_v34 = vpack.c.bf16 %v1306_v30, %v1306_v30  ;;  %v1070_v36 = vadd.f32 %v2433_v61, %v900_v32 }
  0xf1   : > { %v823_v37 = vpop.f32.mrf.mxu0 }
  0xf2   : > { %1906 = vmatmul.msk.bf16.gmra.mxu1 %vm690_vm2, %v1712_v42  ;;  %v1339_v39 = vpack.c.bf16 %v1275_v31, %v1275_v31  ;;  %v993_v12 = vadd.f32 %v992_v45, %v823_v37  ;;  %1923 = vmatmul.msk.bf16.gmra.mxu3 %vm690_vm2, %v1848_v29  ;;  %1435 = vst.msk [vmem:[%s2399_s29 + $0x98] sm:$0xf] %vm1396_vm3, %v1370_v34  ;;  %v1961_v37 = vld [vmem:[%s2259_s24 + $0xf4] sm:$0xf] }
  0xf3   : > { %v1175_v40 = vmul.f32 %v2377_v5, %v1070_v36 }
  0xf4   : > { %1404 = vst.msk [vmem:[%s2399_s29 + $0x1c] sm:$0xf] %vm1396_vm3, %v1339_v39  ;;  %v1144_v41 = vmul.f32 %v2377_v5, %v993_v12  ;;  %862 = vmatmul.bf16.gmra.mxu0 %v1700_v33  ;;  %942 = vmatmul.bf16.gmra.mxu2 %v1828_v38  ;;  %v1725_v38 = vld [vmem:[%s2259_s24 + $0xf8] sm:$0xf0] }
  0xf5   : > { %v1243_v61 = vadd.f32 %v2383_v10, %v1175_v40  ;;  %v2512_v44 = vpop.f32.mrf.mxu3 }
  0xf6   : > { %v1212_v45 = vadd.f32 %v2383_v10, %v1144_v41  ;;  %v1728_v41 = vor.u32 %v1961_v37, %v1725_v38 }
  0xf7   : > { %v999_v46 = vpop.f32.mrf.mxu1  ;;  %v1307_v47 = vmax.f32 %v1243_v61, 0.0  ;;  %v903_v49 = vpop.f32.mrf.mxu2  ;;  %v1715_v61 = vld [vmem:[%s2259_s24 + $0xe0] sm:$0xf] }
  0xf8   : > { %v1276_v48 = vmax.f32 %v1212_v45, 0.0  ;;  %v1073_v51 = vadd.f32 %v2448_v20, %v903_v49  ;;  %v1720_v20 = vor.u32 %v1959_v56, %v1717_v57 }
  0xf9   : > { %v1371_v50 = vpack.c.bf16 %v1307_v47, %v1307_v47  ;;  %v825_v52 = vpop.f32.mrf.mxu0 }
  0xfa   : > { %v1340_v53 = vpack.c.bf16 %v1276_v48, %v1276_v48  ;;  %v995_v54 = vadd.f32 %v994_v1, %v825_v52  ;;  %v1176_v58 = vmul.f32 %v2377_v5, %v1073_v51  ;;  %v1992_v48 = vld [vmem:[%s2259_s24 + $0x1e4] sm:$0xf0] }
  0xfb   : > { %1436 = vst.msk [vmem:[%s2399_s29 + $0x9c] sm:$0xf] %vm1396_vm3, %v1371_v50 }
  0xfc   : > { %1405 = vst.msk [vmem:[%s2399_s29 + $0x20] sm:$0xf] %vm1396_vm3, %v1340_v53  ;;  %v1145_v55 = vmul.f32 %v2377_v5, %v995_v54  ;;  %v1244_v28 = vadd.f32 %v2383_v10, %v1176_v58 }
  0xfd   : > { %v2529_v1 = vpop.f32.mrf.mxu3 }
  0xfe   : > { %v1213_v3 = vadd.f32 %v2383_v10, %v1145_v55  ;;  %v1308_v9 = vmax.f32 %v1244_v28, 0.0 }
  0xff   : > { %v1002_v4 = vpop.f32.mrf.mxu1  ;;  %v905_v13 = vpop.f32.mrf.mxu2 }
 0x100   : > { %v1277_v11 = vmax.f32 %v1213_v3, 0.0  ;;  %v1372_v15 = vpack.c.bf16 %v1308_v9, %v1308_v9  ;;  %v1075_v17 = vadd.f32 %v2465_v43, %v905_v13  ;;  %v1963_v13 = vld [vmem:[%s2259_s24 + $0x104] sm:$0xf] }
 0x101   : > { %v828_v18 = vpop.f32.mrf.mxu0 }
 0x102   : > { %1907 = vmatmul.msk.bf16.gmra.mxu1 %vm690_vm2, %v1720_v20  ;;  %v1341_v0 = vpack.c.bf16 %v1277_v11, %v1277_v11  ;;  %v998_v42 = vadd.f32 %v997_v25, %v828_v18  ;;  %1924 = vmatmul.msk.bf16.gmra.mxu3 %vm690_vm2, %v1856_v8  ;;  %1437 = vst.msk [vmem:[%s2399_s29 + $0xa0] sm:$0xf] %vm1396_vm3, %v1372_v15 }
 0x103   : > { %v1177_v21 = vmul.f32 %v2377_v5, %v1075_v17 }
 0x104   : > { %1406 = vst.msk [vmem:[%s2399_s29 + $0x24] sm:$0xf] %vm1396_vm3, %v1341_v0  ;;  %v1146_v23 = vmul.f32 %v2377_v5, %v998_v42  ;;  %867 = vmatmul.bf16.gmra.mxu0 %v1708_v14  ;;  %947 = vmatmul.bf16.gmra.mxu2 %v1836_v19  ;;  %v1733_v14 = vld [vmem:[%s2259_s24 + $0x108] sm:$0xf0]  ;;  %v1723_v0 = vld [vmem:[%s2259_s24 + $0xf0] sm:$0xf] }
 0x105   : > { %v1245_v43 = vadd.f32 %v2383_v10, %v1177_v21  ;;  %v2545_v26 = vpop.f32.mrf.mxu3  ;;  %v1962_v42 = vld [vmem:[%s2259_s24 + $0xf4] sm:$0xf0] }
 0x106   : > { %v1214_v24 = vadd.f32 %v2383_v10, %v1146_v23 }
 0x107   : > { %v1004_v25 = vpop.f32.mrf.mxu1  ;;  %v1309_v27 = vmax.f32 %v1245_v43, 0.0  ;;  %v908_v30 = vpop.f32.mrf.mxu2  ;;  %v1851_v43 = vld [vmem:[%s2259_s24 + $0x1f0] sm:$0xf] }
 0x108   : > { %v1278_v29 = vmax.f32 %v1214_v24, 0.0  ;;  %v1078_v32 = vadd.f32 %v2480_v62, %v908_v30  ;;  %v1960_v62 = vld [vmem:[%s2259_s24 + $0xe4] sm:$0xf0]  ;;  %v1994_v24 = vld [vmem:[%s2259_s24 + $0x1f4] sm:$0xf0]  ;;  %v1724_v30 = vor.u32 %v1962_v42, %v1723_v0 }
 0x109   : > { %v1373_v31 = vpack.c.bf16 %v1309_v27, %v1309_v27  ;;  %v830_v33 = vpop.f32.mrf.mxu0  ;;  %v1716_v52 = vor.u32 %v1960_v62, %v1715_v61 }
 0x10a   : > { %v1342_v34 = vpack.c.bf16 %v1278_v29, %v1278_v29  ;;  %v1000_v36 = vadd.f32 %v999_v46, %v830_v33  ;;  %v1178_v39 = vmul.f32 %v2377_v5, %v1078_v32  ;;  %v1843_v46 = vld [vmem:[%s2259_s24 + $0x1e0] sm:$0xf]  ;;  %s2097_s24 = scalar_lea.hbm %s2811_s4, 1024 }
 0x10b   : > { %1438 = vst.msk [vmem:[%s2399_s29 + $0xa4] sm:$0xf] %vm1396_vm3, %v1373_v31  ;;  %v1844_v58 = vor.u32 %v1992_v48, %v1843_v46  ;;  %p2099_p2 = scmp.lt.s32.totalorder %s2097_s24, %s2093_s14 }
 0x10c   : > { %1407 = vst.msk [vmem:[%s2399_s29 + $0x28] sm:$0xf] %vm1396_vm3, %v1342_v34  ;;  %v1147_v12 = vmul.f32 %v2377_v5, %v1000_v36  ;;  %v1246_v40 = vadd.f32 %v2383_v10, %v1178_v39  ;;  %v1852_v34 = vor.u32 %v1994_v24, %v1851_v43 }
 0x10d   : > { %v2562_v53 = vpop.f32.mrf.mxu3  ;;  %p2100_p3 = por %p2099_p2, %p2098_p1 }
 0x10e   : > { %v1215_v45 = vadd.f32 %v2383_v10, %v1147_v12  ;;  %v1310_v49 = vmax.f32 %v1246_v40, 0.0 }
 0x10f   : > { %v1007_v47 = vpop.f32.mrf.mxu1  ;;  %v910_v51 = vpop.f32.mrf.mxu2  ;;  %p2101_p5 = pnand %p2100_p3, %p2096_p0 }
 0x110   : > { %v1279_v50 = vmax.f32 %v1215_v45, 0.0  ;;  %v1374_v54 = vpack.c.bf16 %v1310_v49, %v1310_v49  ;;  %v1080_v56 = vadd.f32 %v2497_v22, %v910_v51 }
 0x111   : > { %v833_v57 = vpop.f32.mrf.mxu0 }
 0x112   : > { %1908 = vmatmul.msk.bf16.gmra.mxu1 %vm690_vm2, %v1728_v41  ;;  %v1343_v59 = vpack.c.bf16 %v1279_v50, %v1279_v50  ;;  %v1003_v60 = vadd.f32 %v1002_v4, %v833_v57  ;;  %1439 = vst.msk [vmem:[%s2399_s29 + $0xa8] sm:$0xf] %vm1396_vm3, %v1374_v54  ;;  %v1179_v55 = vmul.f32 %v2377_v5, %v1080_v56 }
 0x114   : > { %1408 = vst.msk [vmem:[%s2399_s29 + $0x2c] sm:$0xf] %vm1396_vm3, %v1343_v59  ;;  %v1148_v28 = vmul.f32 %v2377_v5, %v1003_v60  ;;  %872 = vmatmul.bf16.gmra.mxu0 %v1716_v52  ;;  %v1247_v22 = vadd.f32 %v2383_v10, %v1179_v55  ;;  %952 = vmatmul.bf16.gmra.mxu2 %v1844_v58 }
 0x115   : > { %v2577_v15 = vpop.f32.mrf.mxu3 }
 0x116   : > { %v1216_v20 = vadd.f32 %v2383_v10, %v1148_v28  ;;  %v1311_v2 = vmax.f32 %v1247_v22, 0.0 }
 0x117   : > { %v1009_v63 = vpop.f32.mrf.mxu1  ;;  %v913_v4 = vpop.f32.mrf.mxu2 }
 0x118   : > { %v1280_v3 = vmax.f32 %v1216_v20, 0.0  ;;  %v1375_v6 = vpack.c.bf16 %v1311_v2, %v1311_v2  ;;  %v1083_v7 = vadd.f32 %v2512_v44, %v913_v4  ;;  %v1736_v44 = vor.u32 %v1963_v13, %v1733_v14 }
 0x119   : > { %v835_v8 = vpop.f32.mrf.mxu0 }
 0x11a   : > { %v1344_v9 = vpack.c.bf16 %v1280_v3, %v1280_v3  ;;  %v1005_v11 = vadd.f32 %v1004_v25, %v835_v8  ;;  %1440 = vst.msk [vmem:[%s2399_s29 + $0xac] sm:$0xf] %vm1396_vm3, %v1375_v6  ;;  %v1180_v17 = vmul.f32 %v2377_v5, %v1083_v7 }
 0x11c   : > { %1409 = vst.msk [vmem:[%s2399_s29 + $0x30] sm:$0xf] %vm1396_vm3, %v1344_v9  ;;  %v1149_v18 = vmul.f32 %v2377_v5, %v1005_v11  ;;  %v1248_v19 = vadd.f32 %v2383_v10, %v1180_v17 }
 0x11d   : > { %v1094_v12 = vpop.f32.mrf.mxu3 }
 0x11e   : > { %v1217_v21 = vadd.f32 %v2383_v10, %v1149_v18  ;;  %v1312_v25 = vmax.f32 %v1248_v19, 0.0 }
 0x11f   : > { %v1012_v23 = vpop.f32.mrf.mxu1  ;;  %v915_v29 = vpop.f32.mrf.mxu2 }
 0x120   : > { %v1281_v27 = vmax.f32 %v1217_v21, 0.0  ;;  %v1376_v31 = vpack.c.bf16 %v1312_v25, %v1312_v25  ;;  %v1085_v32 = vadd.f32 %v2529_v1, %v915_v29 }
 0x121   : > { %v838_v33 = vpop.f32.mrf.mxu0 }
 0x122   : > { %1909 = vmatmul.msk.bf16.gmra.mxu1 %vm690_vm2, %v1736_v44  ;;  %v1345_v36 = vpack.c.bf16 %v1281_v27, %v1281_v27  ;;  %v1008_v37 = vadd.f32 %v1007_v47, %v838_v33  ;;  %1441 = vst.msk [vmem:[%s2399_s29 + $0xb0] sm:$0xf] %vm1396_vm3, %v1376_v31  ;;  %v1181_v38 = vmul.f32 %v2377_v5, %v1085_v32 }
 0x124   : > { %1410 = vst.msk [vmem:[%s2399_s29 + $0x34] sm:$0xf] %vm1396_vm3, %v1345_v36  ;;  %v1150_v39 = vmul.f32 %v2377_v5, %v1008_v37  ;;  %877 = vmatmul.bf16.gmra.mxu0 %v1724_v30  ;;  %v1249_v1 = vadd.f32 %v2383_v10, %v1181_v38  ;;  %957 = vmatmul.bf16.gmra.mxu2 %v1852_v34 }
 0x125   : > { %v1097_v58 = vpop.f32.mrf.mxu3 }
 0x126   : > { %v1218_v40 = vadd.f32 %v2383_v10, %v1150_v39  ;;  %v1313_v61 = vmax.f32 %v1249_v1, 0.0 }
 0x127   : > { %v1014_v41 = vpop.f32.mrf.mxu1  ;;  %v918_v45 = vpop.f32.mrf.mxu2 }
 0x128   : > { %v1282_v62 = vmax.f32 %v1218_v40, 0.0  ;;  %v1377_v47 = vpack.c.bf16 %v1313_v61, %v1313_v61  ;;  %v1088_v46 = vadd.f32 %v2545_v26, %v918_v45 }
 0x129   : > { %v840_v48 = vpop.f32.mrf.mxu0 }
 0x12a   : > { %v1346_v49 = vpack.c.bf16 %v1282_v62, %v1282_v62  ;;  %v1010_v50 = vadd.f32 %v1009_v63, %v840_v48  ;;  %1442 = vst.msk [vmem:[%s2399_s29 + $0xb4] sm:$0xf] %vm1396_vm3, %v1377_v47  ;;  %v1182_v51 = vmul.f32 %v2377_v5, %v1088_v46 }
 0x12c   : > { %1411 = vst.msk [vmem:[%s2399_s29 + $0x38] sm:$0xf] %vm1396_vm3, %v1346_v49  ;;  %v1151_v52 = vmul.f32 %v2377_v5, %v1010_v50  ;;  %v1250_v54 = vadd.f32 %v2383_v10, %v1182_v51 }
 0x12d   : > { %v1099_v11 = vpop.f32.mrf.mxu3 }
 0x12e   : > { %v1219_v56 = vadd.f32 %v2383_v10, %v1151_v52  ;;  %v1314_v26 = vmax.f32 %v1250_v54, 0.0 }
 0x12f   : > { %v1017_v57 = vpop.f32.mrf.mxu1  ;;  %v920_v60 = vpop.f32.mrf.mxu2 }
 0x130   : > { %v1283_v59 = vmax.f32 %v1219_v56, 0.0  ;;  %v1378_v55 = vpack.c.bf16 %v1314_v26, %v1314_v26  ;;  %v1090_v28 = vadd.f32 %v2562_v53, %v920_v60 }
 0x131   : > { %v843_v22 = vpop.f32.mrf.mxu0 }
 0x132   : > { %v1347_v20 = vpack.c.bf16 %v1283_v59, %v1283_v59  ;;  %v1013_v63 = vadd.f32 %v1012_v23, %v843_v22  ;;  %1443 = vst.msk [vmem:[%s2399_s29 + $0xb8] sm:$0xf] %vm1396_vm3, %v1378_v55  ;;  %v1183_v2 = vmul.f32 %v2377_v5, %v1090_v28 }
 0x134   : > { %1412 = vst.msk [vmem:[%s2399_s29 + $0x3c] sm:$0xf] %vm1396_vm3, %v1347_v20  ;;  %v1152_v3 = vmul.f32 %v2377_v5, %v1013_v63  ;;  %v1251_v4 = vadd.f32 %v2383_v10, %v1183_v2 }
 0x135   : > { %v1102_v32 = vpop.f32.mrf.mxu3 }
 0x136   : > { %v1220_v6 = vadd.f32 %v2383_v10, %v1152_v3  ;;  %v1315_v8 = vmax.f32 %v1251_v4, 0.0 }
 0x137   : > { %v1019_v7 = vpop.f32.mrf.mxu1  ;;  %v923_v9 = vpop.f32.mrf.mxu2 }
 0x138   : > { %v1284_v53 = vmax.f32 %v1220_v6, 0.0  ;;  %v1379_v13 = vpack.c.bf16 %v1315_v8, %v1315_v8  ;;  %v1093_v14 = vadd.f32 %v2577_v15, %v923_v9 }
 0x139   : > { %v845_v17 = vpop.f32.mrf.mxu0 }
 0x13a   : > { %v1348_v18 = vpack.c.bf16 %v1284_v53, %v1284_v53  ;;  %v1015_v19 = vadd.f32 %v1014_v41, %v845_v17  ;;  %1444 = vst.msk [vmem:[%s2399_s29 + $0xbc] sm:$0xf] %vm1396_vm3, %v1379_v13  ;;  %v1184_v44 = vmul.f32 %v2377_v5, %v1093_v14 }
 0x13c   : > { %1413 = vst.msk [vmem:[%s2399_s29 + $0x40] sm:$0xf] %vm1396_vm3, %v1348_v18  ;;  %v1153_v0 = vmul.f32 %v2377_v5, %v1015_v19  ;;  %v1252_v42 = vadd.f32 %v2383_v10, %v1184_v44 }
 0x13d   : > { %v1104_v48 = vpop.f32.mrf.mxu3 }
 0x13e   : > { %v1221_v21 = vadd.f32 %v2383_v10, %v1153_v0  ;;  %v1316_v43 = vmax.f32 %v1252_v42, 0.0 }
 0x13f   : > { %v1022_v23 = vpop.f32.mrf.mxu1  ;;  %v925_v24 = vpop.f32.mrf.mxu2 }
 0x140   : > { %v1285_v15 = vmax.f32 %v1221_v21, 0.0  ;;  %v1380_v25 = vpack.c.bf16 %v1316_v43, %v1316_v43  ;;  %v1095_v27 = vadd.f32 %v1094_v12, %v925_v24 }
 0x141   : > { %v848_v29 = vpop.f32.mrf.mxu0 }
 0x142   : > { %v1349_v30 = vpack.c.bf16 %v1285_v15, %v1285_v15  ;;  %v1018_v31 = vadd.f32 %v1017_v57, %v848_v29  ;;  %1445 = vst.msk [vmem:[%s2399_s29 + $0xc0] sm:$0xf] %vm1396_vm3, %v1380_v25  ;;  %v1185_v33 = vmul.f32 %v2377_v5, %v1095_v27 }
 0x144   : > { %1414 = vst.msk [vmem:[%s2399_s29 + $0x44] sm:$0xf] %vm1396_vm3, %v1349_v30  ;;  %v1154_v34 = vmul.f32 %v2377_v5, %v1018_v31  ;;  %v1253_v36 = vadd.f32 %v2383_v10, %v1185_v33 }
 0x145   : > { %v1107_v2 = vpop.f32.mrf.mxu3 }
 0x146   : > { %v1222_v37 = vadd.f32 %v2383_v10, %v1154_v34  ;;  %v1317_v39 = vmax.f32 %v1253_v36, 0.0 }
 0x147   : > { %v1024_v38 = vpop.f32.mrf.mxu1  ;;  %v928_v1 = vpop.f32.mrf.mxu2 }
 0x148   : > { %v1286_v12 = vmax.f32 %v1222_v37, 0.0  ;;  %v1381_v40 = vpack.c.bf16 %v1317_v39, %v1317_v39  ;;  %v1098_v41 = vadd.f32 %v1097_v58, %v928_v1 }
 0x149   : > { %v850_v61 = vpop.f32.mrf.mxu0 }
 0x14a   : > { %v1350_v62 = vpack.c.bf16 %v1286_v12, %v1286_v12  ;;  %v1020_v45 = vadd.f32 %v1019_v7, %v850_v61  ;;  %1446 = vst.msk [vmem:[%s2399_s29 + $0xc4] sm:$0xf] %vm1396_vm3, %v1381_v40  ;;  %v1186_v47 = vmul.f32 %v2377_v5, %v1098_v41 }
 0x14c   : > { %1415 = vst.msk [vmem:[%s2399_s29 + $0x48] sm:$0xf] %vm1396_vm3, %v1350_v62  ;;  %v1155_v46 = vmul.f32 %v2377_v5, %v1020_v45  ;;  %v1254_v49 = vadd.f32 %v2383_v10, %v1186_v47 }
 0x14d   : > { %v1109_v21 = vpop.f32.mrf.mxu3 }
 0x14e   : > { %v1223_v50 = vadd.f32 %v2383_v10, %v1155_v46  ;;  %v1318_v52 = vmax.f32 %v1254_v49, 0.0 }
 0x14f   : > { %v1027_v51 = vpop.f32.mrf.mxu1  ;;  %v930_v56 = vpop.f32.mrf.mxu2 }
 0x150   : > { %v1287_v54 = vmax.f32 %v1223_v50, 0.0  ;;  %v1382_v57 = vpack.c.bf16 %v1318_v52, %v1318_v52  ;;  %v1100_v58 = vadd.f32 %v1099_v11, %v930_v56 }
 0x151   : > { %v853_v26 = vpop.f32.mrf.mxu0 }
 0x152   : > { %v1351_v59 = vpack.c.bf16 %v1287_v54, %v1287_v54  ;;  %v1023_v60 = vadd.f32 %v1022_v23, %v853_v26  ;;  %1447 = vst.msk [vmem:[%s2399_s29 + $0xc8] sm:$0xf] %vm1396_vm3, %v1382_v57  ;;  %v1187_v55 = vmul.f32 %v2377_v5, %v1100_v58 }
 0x154   : > { %1416 = vst.msk [vmem:[%s2399_s29 + $0x4c] sm:$0xf] %vm1396_vm3, %v1351_v59  ;;  %v1156_v28 = vmul.f32 %v2377_v5, %v1023_v60  ;;  %v1255_v22 = vadd.f32 %v2383_v10, %v1187_v55 }
 0x155   : > { %v1112_v40 = vpop.f32.mrf.mxu3 }
 0x156   : > { %v1224_v20 = vadd.f32 %v2383_v10, %v1156_v28  ;;  %v1319_v3 = vmax.f32 %v1255_v22, 0.0 }
 0x157   : > { %v1029_v63 = vpop.f32.mrf.mxu1  ;;  %v933_v6 = vpop.f32.mrf.mxu2 }
 0x158   : > { %v1288_v4 = vmax.f32 %v1224_v20, 0.0  ;;  %v1383_v7 = vpack.c.bf16 %v1319_v3, %v1319_v3  ;;  %v1103_v8 = vadd.f32 %v1102_v32, %v933_v6 }
 0x159   : > { %v855_v53 = vpop.f32.mrf.mxu0 }
 0x15a   : > { %v1352_v9 = vpack.c.bf16 %v1288_v4, %v1288_v4  ;;  %v1025_v11 = vadd.f32 %v1024_v38, %v855_v53  ;;  %1448 = vst.msk [vmem:[%s2399_s29 + $0xcc] sm:$0xf] %vm1396_vm3, %v1383_v7  ;;  %v1188_v13 = vmul.f32 %v2377_v5, %v1103_v8 }
 0x15c   : > { %1417 = vst.msk [vmem:[%s2399_s29 + $0x50] sm:$0xf] %vm1396_vm3, %v1352_v9  ;;  %v1157_v14 = vmul.f32 %v2377_v5, %v1025_v11  ;;  %v1256_v17 = vadd.f32 %v2383_v10, %v1188_v13 }
 0x15d   : > { %v1114_v26 = vpop.f32.mrf.mxu3 }
 0x15e   : > { %v1225_v18 = vadd.f32 %v2383_v10, %v1157_v14  ;;  %v1320_v44 = vmax.f32 %v1256_v17, 0.0 }
 0x15f   : > { %v1032_v19 = vpop.f32.mrf.mxu1  ;;  %v935_v42 = vpop.f32.mrf.mxu2 }
 0x160   : > { %v1289_v0 = vmax.f32 %v1225_v18, 0.0  ;;  %v1384_v23 = vpack.c.bf16 %v1320_v44, %v1320_v44  ;;  %v1105_v43 = vadd.f32 %v1104_v48, %v935_v42 }
 0x161   : > { %v858_v15 = vpop.f32.mrf.mxu0 }
 0x162   : > { %v1353_v24 = vpack.c.bf16 %v1289_v0, %v1289_v0  ;;  %v1028_v25 = vadd.f32 %v1027_v51, %v858_v15  ;;  %1449 = vst.msk [vmem:[%s2399_s29 + $0xd0] sm:$0xf] %vm1396_vm3, %v1384_v23  ;;  %v1189_v27 = vmul.f32 %v2377_v5, %v1105_v43 }
 0x164   : > { %1418 = vst.msk [vmem:[%s2399_s29 + $0x54] sm:$0xf] %vm1396_vm3, %v1353_v24  ;;  %v1158_v29 = vmul.f32 %v2377_v5, %v1028_v25  ;;  %v1257_v30 = vadd.f32 %v2383_v10, %v1189_v27 }
 0x165   : > { %v1117_v13 = vpop.f32.mrf.mxu3 }
 0x166   : > { %v1226_v31 = vadd.f32 %v2383_v10, %v1158_v29  ;;  %v1321_v33 = vmax.f32 %v1257_v30, 0.0 }
 0x167   : > { %v1034_v32 = vpop.f32.mrf.mxu1  ;;  %v938_v36 = vpop.f32.mrf.mxu2 }
 0x168   : > { %v1290_v34 = vmax.f32 %v1226_v31, 0.0  ;;  %v1385_v37 = vpack.c.bf16 %v1321_v33, %v1321_v33  ;;  %v1108_v38 = vadd.f32 %v1107_v2, %v938_v36 }
 0x169   : > { %v860_v39 = vpop.f32.mrf.mxu0 }
 0x16a   : > { %v1354_v12 = vpack.c.bf16 %v1290_v34, %v1290_v34  ;;  %v1030_v1 = vadd.f32 %v1029_v63, %v860_v39  ;;  %1450 = vst.msk [vmem:[%s2399_s29 + $0xd4] sm:$0xf] %vm1396_vm3, %v1385_v37  ;;  %v1190_v41 = vmul.f32 %v2377_v5, %v1108_v38 }
 0x16c   : > { %1419 = vst.msk [vmem:[%s2399_s29 + $0x58] sm:$0xf] %vm1396_vm3, %v1354_v12  ;;  %v1159_v61 = vmul.f32 %v2377_v5, %v1030_v1  ;;  %v1258_v62 = vadd.f32 %v2383_v10, %v1190_v41 }
 0x16d   : > { %v1119_v31 = vpop.f32.mrf.mxu3 }
 0x16e   : > { %v1227_v45 = vadd.f32 %v2383_v10, %v1159_v61  ;;  %v1322_v46 = vmax.f32 %v1258_v62, 0.0 }
 0x16f   : > { %v1037_v47 = vpop.f32.mrf.mxu1  ;;  %v940_v49 = vpop.f32.mrf.mxu2 }
 0x170   : > { %v1291_v48 = vmax.f32 %v1227_v45, 0.0  ;;  %v1386_v50 = vpack.c.bf16 %v1322_v46, %v1322_v46  ;;  %v1110_v51 = vadd.f32 %v1109_v21, %v940_v49 }
 0x171   : > { %v863_v52 = vpop.f32.mrf.mxu0 }
 0x172   : > { %v1355_v54 = vpack.c.bf16 %v1291_v48, %v1291_v48  ;;  %v1033_v56 = vadd.f32 %v1032_v19, %v863_v52  ;;  %1451 = vst.msk [vmem:[%s2399_s29 + $0xd8] sm:$0xf] %vm1396_vm3, %v1386_v50  ;;  %v1191_v57 = vmul.f32 %v2377_v5, %v1110_v51 }
 0x174   : > { %1420 = vst.msk [vmem:[%s2399_s29 + $0x5c] sm:$0xf] %vm1396_vm3, %v1355_v54  ;;  %v1160_v58 = vmul.f32 %v2377_v5, %v1033_v56  ;;  %v1259_v59 = vadd.f32 %v2383_v10, %v1191_v57 }
 0x175   : > { %v1122_v49 = vpop.f32.mrf.mxu3 }
 0x176   : > { %v1228_v60 = vadd.f32 %v2383_v10, %v1160_v58  ;;  %v1323_v28 = vmax.f32 %v1259_v59, 0.0 }
 0x177   : > { %v1039_v55 = vpop.f32.mrf.mxu1  ;;  %v943_v20 = vpop.f32.mrf.mxu2 }
 0x178   : > { %v1292_v22 = vmax.f32 %v1228_v60, 0.0  ;;  %v1387_v63 = vpack.c.bf16 %v1323_v28, %v1323_v28  ;;  %v1113_v2 = vadd.f32 %v1112_v40, %v943_v20 }
 0x179   : > { %v865_v3 = vpop.f32.mrf.mxu0 }
 0x17a   : > { %v1356_v4 = vpack.c.bf16 %v1292_v22, %v1292_v22  ;;  %v1035_v6 = vadd.f32 %v1034_v32, %v865_v3  ;;  %1452 = vst.msk [vmem:[%s2399_s29 + $0xdc] sm:$0xf] %vm1396_vm3, %v1387_v63  ;;  %v1192_v7 = vmul.f32 %v2377_v5, %v1113_v2 }
 0x17c   : > { %1421 = vst.msk [vmem:[%s2399_s29 + $0x60] sm:$0xf] %vm1396_vm3, %v1356_v4  ;;  %v1161_v8 = vmul.f32 %v2377_v5, %v1035_v6  ;;  %v1260_v53 = vadd.f32 %v2383_v10, %v1192_v7  ;;  %v2697_v5 = vld [vmem:[%s2809_s2] ss:$0 sm:$0xff] }
 0x17d   : > { %v1124_v2 = vpop.f32.mrf.mxu3 }
 0x17e   : > { %v1229_v9 = vadd.f32 %v2383_v10, %v1161_v8  ;;  %v1324_v14 = vmax.f32 %v1260_v53, 0.0 }
 0x17f   : > { %v1042_v11 = vpop.f32.mrf.mxu1  ;;  %v945_v18 = vpop.f32.mrf.mxu2 }
 0x180   : > { %v1293_v17 = vmax.f32 %v1229_v9, 0.0  ;;  %v1388_v19 = vpack.c.bf16 %v1324_v14, %v1324_v14  ;;  %v1115_v44 = vadd.f32 %v1114_v26, %v945_v18 }
 0x181   : > { %v868_v0 = vpop.f32.mrf.mxu0 }
 0x182   : > { %v1357_v42 = vpack.c.bf16 %v1293_v17, %v1293_v17  ;;  %v1038_v21 = vadd.f32 %v1037_v47, %v868_v0  ;;  %1453 = vst.msk [vmem:[%s2399_s29 + $0xe0] sm:$0xf] %vm1396_vm3, %v1388_v19  ;;  %v1193_v23 = vmul.f32 %v2697_v5, %v1115_v44 }
 0x184   : > { %1422 = vst.msk [vmem:[%s2399_s29 + $0x64] sm:$0xf] %vm1396_vm3, %v1357_v42  ;;  %v1162_v43 = vmul.f32 %v2697_v5, %v1038_v21  ;;  %v1261_v15 = vadd.f32 %v2383_v10, %v1193_v23 }
 0x186   : > { %v1230_v24 = vadd.f32 %v2383_v10, %v1162_v43  ;;  %v1325_v27 = vmax.f32 %v1261_v15, 0.0  ;;  %v2714_v10 = vld [vmem:[%s2810_s3] ss:$0 sm:$0xff]  ;;  %v1127_v43 = vpop.f32.mrf.mxu3 }
 0x187   : > { %v1044_v25 = vpop.f32.mrf.mxu1  ;;  %v948_v30 = vpop.f32.mrf.mxu2 }
 0x188   : > { %v1294_v29 = vmax.f32 %v1230_v24, 0.0  ;;  %v1389_v32 = vpack.c.bf16 %v1325_v27, %v1325_v27  ;;  %v1118_v33 = vadd.f32 %v1117_v13, %v948_v30 }
 0x189   : > { %v870_v34 = vpop.f32.mrf.mxu0 }
 0x18a   : > { %v1358_v36 = vpack.c.bf16 %v1294_v29, %v1294_v29  ;;  %v1040_v37 = vadd.f32 %v1039_v55, %v870_v34  ;;  %1454 = vst.msk [vmem:[%s2399_s29 + $0xe4] sm:$0xf] %vm1396_vm3, %v1389_v32  ;;  %v1194_v38 = vmul.f32 %v2697_v5, %v1118_v33 }
 0x18c   : > { %1423 = vst.msk [vmem:[%s2399_s29 + $0x68] sm:$0xf] %vm1396_vm3, %v1358_v36  ;;  %v1163_v39 = vmul.f32 %v2697_v5, %v1040_v37  ;;  %v1262_v12 = vadd.f32 %v2714_v10, %v1194_v38 }
 0x18e   : > { %v1231_v1 = vadd.f32 %v2714_v10, %v1163_v39  ;;  %v1326_v41 = vmax.f32 %v1262_v12, 0.0 }
 0x18f   : > { %v1047_v40 = vpop.f32.mrf.mxu1  ;;  %v950_v62 = vpop.f32.mrf.mxu2 }
 0x190   : > { %v1295_v61 = vmax.f32 %v1231_v1, 0.0  ;;  %v1390_v45 = vpack.c.bf16 %v1326_v41, %v1326_v41  ;;  %v1120_v47 = vadd.f32 %v1119_v31, %v950_v62 }
 0x191   : > { %v873_v46 = vpop.f32.mrf.mxu0 }
 0x192   : > { %v1359_v48 = vpack.c.bf16 %v1295_v61, %v1295_v61  ;;  %v1043_v50 = vadd.f32 %v1042_v11, %v873_v46  ;;  %1455 = vst.msk [vmem:[%s2399_s29 + $0xe8] sm:$0xf] %vm1396_vm3, %v1390_v45  ;;  %v1195_v51 = vmul.f32 %v2697_v5, %v1120_v47  ;;  %v1129_v45 = vpop.f32.mrf.mxu3 }
 0x194   : > { %1424 = vst.msk [vmem:[%s2399_s29 + $0x6c] sm:$0xf] %vm1396_vm3, %v1359_v48  ;;  %v1164_v52 = vmul.f32 %v2697_v5, %v1043_v50  ;;  %v1263_v54 = vadd.f32 %v2714_v10, %v1195_v51 }
 0x196   : > { %v1232_v56 = vadd.f32 %v2714_v10, %v1164_v52  ;;  %v1327_v58 = vmax.f32 %v1263_v54, 0.0 }
 0x197   : > { %v1049_v57 = vpop.f32.mrf.mxu1  ;;  %v953_v59 = vpop.f32.mrf.mxu2 }
 0x198   : > { %v1296_v26 = vmax.f32 %v1232_v56, 0.0  ;;  %v1391_v60 = vpack.c.bf16 %v1327_v58, %v1327_v58  ;;  %v1123_v55 = vadd.f32 %v1122_v49, %v953_v59 }
 0x199   : > { %v875_v28 = vpop.f32.mrf.mxu0 }
 0x19a   : > { %v1360_v22 = vpack.c.bf16 %v1296_v26, %v1296_v26  ;;  %v1045_v20 = vadd.f32 %v1044_v25, %v875_v28  ;;  %1456 = vst.msk [vmem:[%s2399_s29 + $0xec] sm:$0xf] %vm1396_vm3, %v1391_v60  ;;  %v1196_v63 = vmul.f32 %v2697_v5, %v1123_v55 }
 0x19c   : > { %1425 = vst.msk [vmem:[%s2399_s29 + $0x70] sm:$0xf] %vm1396_vm3, %v1360_v22  ;;  %v1165_v3 = vmul.f32 %v2697_v5, %v1045_v20  ;;  %v1264_v4 = vadd.f32 %v2714_v10, %v1196_v63 }
 0x19e   : > { %v1233_v6 = vadd.f32 %v2714_v10, %v1165_v3  ;;  %v1328_v8 = vmax.f32 %v1264_v4, 0.0 }
 0x19f   : > { %v1052_v7 = vpop.f32.mrf.mxu1  ;;  %v955_v11 = vpop.f32.mrf.mxu2 }
 0x1a0   : > { %v1053_v53 = vadd.f32 %v1052_v7, %v2393_v16  ;;  %v1297_v9 = vmax.f32 %v1233_v6, 0.0  ;;  %v1392_v13 = vpack.c.bf16 %v1328_v8, %v1328_v8  ;;  %v1125_v17 = vadd.f32 %v1124_v2, %v955_v11 }
 0x1a1   : > { %v878_v18 = vpop.f32.mrf.mxu0 }
 0x1a2   : > { %v1168_v14 = vmul.f32 %v2697_v5, %v1053_v53  ;;  %v1361_v19 = vpack.c.bf16 %v1297_v9, %v1297_v9  ;;  %v1048_v44 = vadd.f32 %v1047_v40, %v878_v18  ;;  %1457 = vst.msk [vmem:[%s2399_s29 + $0xf0] sm:$0xf] %vm1396_vm3, %v1392_v13  ;;  %v1197_v42 = vmul.f32 %v2697_v5, %v1125_v17 }
 0x1a4   : > { %v1236_v0 = vadd.f32 %v2714_v10, %v1168_v14  ;;  %1426 = vst.msk [vmem:[%s2399_s29 + $0x74] sm:$0xf] %vm1396_vm3, %v1361_v19  ;;  %v1166_v16 = vmul.f32 %v2697_v5, %v1048_v44  ;;  %v1265_v23 = vadd.f32 %v2714_v10, %v1197_v42 }
 0x1a6   : > { %v1300_v21 = vmax.f32 %v1236_v0, 0.0  ;;  %v1234_v15 = vadd.f32 %v2714_v10, %v1166_v16  ;;  %v1329_v27 = vmax.f32 %v1265_v23, 0.0 }
 0x1a7   : > { %v1054_v24 = vpop.f32.mrf.mxu1  ;;  %v958_v31 = vpop.f32.mrf.mxu2 }
 0x1a8   : > { %v1364_v25 = vpack.c.bf16 %v1300_v21, %v1300_v21  ;;  %v1055_v29 = vadd.f32 %v1054_v24, %v2411_v35  ;;  %v1298_v30 = vmax.f32 %v1234_v15, 0.0  ;;  %v1393_v32 = vpack.c.bf16 %v1329_v27, %v1329_v27 }
 0x1a9   : > { %v1128_v34 = vadd.f32 %v1127_v43, %v958_v31  ;;  %v880_v36 = vpop.f32.mrf.mxu0 }
 0x1aa   : > { %1429 = vst.msk [vmem:[%s2399_s29 + $0x80] sm:$0xf] %vm1396_vm3, %v1364_v25  ;;  %v1169_v33 = vmul.f32 %v2697_v5, %v1055_v29  ;;  %v1362_v37 = vpack.c.bf16 %v1298_v30, %v1298_v30  ;;  %v1050_v38 = vadd.f32 %v1049_v57, %v880_v36 }
 0x1ab   : > { %1458 = vst.msk [vmem:[%s2399_s29 + $0xf4] sm:$0xf] %vm1396_vm3, %v1393_v32  ;;  %v1198_v12 = vmul.f32 %v2697_v5, %v1128_v34 }
 0x1ac   : > { %v1237_v39 = vadd.f32 %v2714_v10, %v1169_v33  ;;  %1427 = vst.msk [vmem:[%s2399_s29 + $0x78] sm:$0xf] %vm1396_vm3, %v1362_v37  ;;  %v1167_v35 = vmul.f32 %v2697_v5, %v1050_v38 }
 0x1ad   : > { %v1266_v40 = vadd.f32 %v2714_v10, %v1198_v12 }
 0x1ae   : > { %v1301_v1 = vmax.f32 %v1237_v39, 0.0  ;;  %v1235_v41 = vadd.f32 %v2714_v10, %v1167_v35 }
 0x1af   : > { %v1330_v62 = vmax.f32 %v1266_v40, 0.0  ;;  %v960_v46 = vpop.f32.mrf.mxu2 }
 0x1b0   : > { %v1365_v61 = vpack.c.bf16 %v1301_v1, %v1301_v1  ;;  %v1299_v47 = vmax.f32 %v1235_v41, 0.0  ;;  %v1130_v49 = vadd.f32 %v1129_v45, %v960_v46 }
 0x1b1   : > { %v1394_v48 = vpack.c.bf16 %v1330_v62, %v1330_v62 }
 0x1b2   : > { %1430 = vst.msk [vmem:[%s2399_s29 + $0x84] sm:$0xf] %vm1396_vm3, %v1365_v61  ;;  %v1363_v50 = vpack.c.bf16 %v1299_v47, %v1299_v47  ;;  %v1199_v51 = vmul.f32 %v2697_v5, %v1130_v49 }
 0x1b3   : > { %1459 = vst.msk [vmem:[%s2399_s29 + $0xf8] sm:$0xf] %vm1396_vm3, %v1394_v48 }
 0x1b4   : > { %1428 = vst.msk [vmem:[%s2399_s29 + $0x7c] sm:$0xf] %vm1396_vm3, %v1363_v50  ;;  %v1267_v52 = vadd.f32 %v2714_v10, %v1199_v51 }
 0x1b6   : > { %v1331_v54 = vmax.f32 %v1267_v52, 0.0 }
 0x1b8   : > { %v1395_v56 = vpack.c.bf16 %v1331_v54, %v1331_v54 }
 0x1ba   : > { %1460 = vst.msk [vmem:[%s2399_s29 + $0xfc] sm:$0xf] %vm1396_vm3, %v1395_v56 }
 0x1bb   : > { %2104 = shalt.err (!%p2101_p5)
}
 0x1bc   : > { %s2158_s22 = smov 64   ;;  %s2159_s29 = smov 4  }
 0x1bd   : > { %2015 = dma.vmem_to_hbm [thread:$0]  (%p2225_p4), %s1476_s18, 4096, %s1478_s11, %s1462_s12, %s2158_s22, %s2158_s22, %s2159_s29  }
 0x1be PF: > { %p2021_p6 = scmp.ge.s32.totalorder %s2155_s20, 2  ;;  %s1492_s6 = sand.u32 1, %s2135_s15  }
 0x1bf   : > { %s1493_s7 = scalar_lea.sflag [#allocation3], %s1492_s6 }
 0x1c0   : > { %p2018_p7 = pnand %p2021_p6, %p2232_p8 }
 0x1c2   : > { %p2019_p9 = pneg %p2018_p7 }
 0x1c4   : > { %2130 = dma.done.wait (%p2019_p9), %s1493_s7, 4096  }
 0x1c5   : > { %2132 = vsyncadd (%p2019_p9), %s1493_s7, 4294963200  ;;  %s17_s20 = sadd.s32 1, %s2155_s20   ;;  %s2814_s15 = smov %s2139_s16 }
 0x1c6   : > { %p14_p10 = scmp.ge.s32.totalorder %s17_s20, 6   ;;  %s2815_s16 = smov %s2143_s17 }
 0x1c7   : > { %s2816_s17 = smov %s2238_s28  ;;  %s2817_s18 = smov %s2151_s19 }
 0x1c8   : > { %s2818_s19 = smov %s2820_s23  ;;  %16 = sbr.rel (!%p14_p10) target bundleno = 4 (0x4), region = 80 }
 0x1cd   :  { %1499 = vsyncpa [#allocation3], 1 }
 0x1ce   :  { %1501 = vsyncpa [#allocation3 + $0x1], 1 }

</bundles_post_ra>
